<compile_context>
chip_gen: v7x
topology: tpu7x:2x2x1
jax: 0.10.0
libtpu: 0.0.40
codegen_flags: <defaults>
</compile_context>

<pallas_src>
import functools

import jax
import jax.numpy as jnp
from jax.experimental import pallas as pl
from jax.experimental.pallas import tpu as pltpu


def _fastgrnn_kernel(scalars_ref,   # SMEM (2,)  f32: [zeta, nu]
                     tlen_ref,      # SMEM (1,)  i32: real seq_len (time-pad masking)
                     x_ref,         # VMEM (Tc*BT, I)  bf16: chunk, t outer / batch-row inner
                     wT_ref,        # VMEM (I, Hp)     bf16: resident
                     uT_ref,        # VMEM (Hp, Hp)    bf16: resident
                     bz_ref,        # VMEM (1, Hp)     f32
                     bh_ref,        # VMEM (1, Hp)     f32
                     out_ref,       # VMEM (BT, Hp)    f32: final hidden for this batch tile
                     h_ref,         # VMEM scratch (BT, Hp) f32: carried across time chunks
                     xw_ref,        # VMEM scratch (Tc*BT, Hp) f32: staged chunk projection
                     *, Tc, BT, needs_mask):
    c = pl.program_id(1)            # time-chunk index ("arbitrary" inner axis)

    @pl.when(c == 0)
    def _():
        h_ref[...] = jnp.zeros_like(h_ref)

    Hp = uT_ref.shape[1]

    # Time-parallel projection of the whole chunk, staged in VMEM scratch
    # (off the serial path; bounds vreg pressure across the unrolled loop).
    # x arrives pre-flattened in the wrapper, so there is no in-kernel reshape.
    xw_ref[...] = jnp.dot(x_ref[...], wT_ref[...],
                          preferred_element_type=jnp.float32)

    # Hoisted bias broadcasts (JAX does not CSE broadcast_in_dim inside loops).
    bz = jnp.broadcast_to(bz_ref[...], (BT, Hp))
    bh = jnp.broadcast_to(bh_ref[...], (BT, Hp))

    zeta = scalars_ref[0]
    zpn = zeta + scalars_ref[1]      # zeta + nu, computed once

    h = h_ref[...]                   # f32 carry
    for t in range(Tc):              # static unroll; Tc is a small compile-time const
        # Serial critical path: one MXU matmul per step. The RHS is read
        # straight from the resident VMEM ref (never hoisted into a value).
        # TODO(synk): hold U^T in the MXU across the chunk via
        # pltpu.matmul_push_rhs / matmul_acc_lhs / matmul_pop to shave the
        # per-step weight push off the serial path.
        pre = jnp.dot(h.astype(jnp.bfloat16), uT_ref[...],
                      preferred_element_type=jnp.float32)        # (BT, Hp) f32
        s = xw_ref[pl.ds(t * BT, BT), :] + pre                   # static, sublane-aligned
        z = jax.nn.sigmoid(s + bz)
        h_tilde = jnp.tanh(s + bh)
        h_new = (zpn - zeta * z) * h_tilde + z * h
        if needs_mask:
            # Padded timesteps (global_t >= seq_len) must leave h unchanged.
            gate = ((c * Tc + t) < tlen_ref[0]).astype(h.dtype)  # scalar 0/1
            h_new = h + gate * (h_new - h)
        h = h_new

    h_ref[...] = h
    out_ref[...] = h.astype(out_ref.dtype)   # cheap VMEM store every chunk


def _round_up(n, m):
    return ((n + m - 1) // m) * m


def _mxu_granule():
    """128 on v5e and older (128x128 MXU); 256 on v6e/v7x (256x256 MXU)."""
    try:
        kind = jax.devices()[0].device_kind.lower()
    except Exception:
        return 128
    return 256 if ("v6" in kind or "v7" in kind) else 128


def _fastgrnn_pallas(x, W, U, b_z, b_h, zeta, nu, *, max_chunk, xw_budget_bytes,
                     single_buffer_residents):
    B, T, I = x.shape
    H = W.shape[0]

    gran = _mxu_granule()
    H_pad = _round_up(H, gran)                 # lane-dense, MXU-granule hidden dim
    BT = min(_round_up(B, 8), gran)            # large batch tile -> MXU row occupancy
    B_pad = _round_up(B, BT)
    nB = B_pad // BT

    # Timesteps per grid iteration: amortize grid overhead / x DMA, bounded by
    # the xw VMEM scratch budget (BT * Tc * H_pad * 4 bytes).
    Tc = max(1, min(max_chunk, T, xw_budget_bytes // (BT * H_pad * 4)))
    T_pad = _round_up(T, Tc)
    nC = T_pad // Tc
    needs_mask = (T_pad != T)

    f32, bf16 = jnp.float32, jnp.bfloat16

    # Zero padding is exact: padded hidden columns see zero weights/bias and
    # h0 = 0 so they stay identically 0; padded batch rows are sliced off at
    # the end; padded timesteps are masked in-kernel so they leave h unchanged.
    x_p = jnp.zeros((B_pad, T_pad, I), bf16).at[:B, :T].set(x.astype(bf16))
    # Re-layout x ONCE in the wrapper so each (chunk, batch-tile) grid block is
    # a contiguous (Tc*BT, I) slab (t outer, batch-row inner): one contiguous
    # DMA per chunk and no in-kernel reshape on the serial path.
    x_r = (x_p.reshape(nB, BT, nC, Tc, I)
              .transpose(2, 0, 3, 1, 4)        # (nC, nB, Tc, BT, I)
              .reshape(nC * nB * Tc * BT, I))

    wT = jnp.zeros((I, H_pad), bf16).at[:, :H].set(W.T.astype(bf16))
    uT = jnp.zeros((H_pad, H_pad), bf16).at[:H, :H].set(U.T.astype(bf16))
    bz = jnp.zeros((1, H_pad), f32).at[0, :H].set(b_z.astype(f32))
    bh = jnp.zeros((1, H_pad), f32).at[0, :H].set(b_h.astype(f32))
    scalars = jnp.stack([jnp.reshape(zeta, ()), jnp.reshape(nu, ())]).astype(f32)
    tlen = jnp.array([T], dtype=jnp.int32)

    # Resident operands (constant index_map): single-buffering avoids wasting a
    # second buffer that is never refilled (critical on v7x's 64 MiB VMEM and
    # v5e's 16 MiB default scoped limit).
    res_kw = dict(pipeline_mode=pl.Buffered(1)) if single_buffer_residents else {}

    kernel = functools.partial(_fastgrnn_kernel, Tc=Tc, BT=BT, needs_mask=needs_mask)

    grid = (nB, nC)
    grid_spec = pltpu.PrefetchScalarGridSpec(
        num_scalar_prefetch=0,
        grid=grid,
        in_specs=[
            pl.BlockSpec(memory_space=pltpu.MemorySpace.SMEM),             # [zeta, nu]
            pl.BlockSpec(memory_space=pltpu.MemorySpace.SMEM),             # seq_len
            pl.BlockSpec((Tc * BT, I), lambda b, c: (c * nB + b, 0)),      # x chunk slab
            pl.BlockSpec((I, H_pad), lambda b, c: (0, 0), **res_kw),       # W^T (resident)
            pl.BlockSpec((H_pad, H_pad), lambda b, c: (0, 0), **res_kw),   # U^T (resident)
            pl.BlockSpec((1, H_pad), lambda b, c: (0, 0), **res_kw),       # b_z
            pl.BlockSpec((1, H_pad), lambda b, c: (0, 0), **res_kw),       # b_h
        ],
        out_specs=pl.BlockSpec((BT, H_pad), lambda b, c: (b, 0)),          # per batch tile
        scratch_shapes=[
            pltpu.VMEM((BT, H_pad), jnp.float32),        # carried hidden state (f32)
            pltpu.VMEM((Tc * BT, H_pad), jnp.float32),   # staged chunk projection
        ],
    )

    wbuf = 1 if single_buffer_residents else 2
    est = (2 * Tc * BT * I * 2              # x blocks (double-buffered, bf16)
           + wbuf * I * H_pad * 2           # W^T (bf16)
           + wbuf * H_pad * H_pad * 2       # U^T (bf16)
           + wbuf * 2 * H_pad * 4           # biases (f32)
           + 2 * BT * H_pad * 4             # output block (double-buffered, f32)
           + BT * H_pad * 4                 # h scratch
           + Tc * BT * H_pad * 4)           # xw scratch
    vmem_limit = int(min(max(2 * est, 32 << 20), 64 << 20))

    out = pl.pallas_call(
        kernel,
        out_shape=jax.ShapeDtypeStruct((B_pad, H_pad), jnp.float32),
        grid_spec=grid_spec,
        compiler_params=pltpu.CompilerParams(
            # Batch tiles are independent ("parallel"); the time-chunk axis is a
            # serial recurrence ("arbitrary").
            # TODO(synk): on v7x use pltpu.CORE_PARALLEL on the batch axis
            # (requires nB >= 2) to shard batch tiles across the 2 TensorCores.
            dimension_semantics=("parallel", "arbitrary"),
            vmem_limit_bytes=vmem_limit,
        ),
    )(scalars, tlen, x_r, wT, uT, bz, bh)

    return jax.block_until_ready(out)[:B, :H]


def fastgrnn_forward(x, W, U, b_z, b_h, zeta, nu, *,
                     max_chunk=32, xw_budget_bytes=8 << 20):
    """x: (batch, seq_len, input_size). Returns final hidden state (batch, hidden)."""
    try:
        return _fastgrnn_pallas(x, W, U, b_z, b_h, zeta, nu,
                                max_chunk=max_chunk,
                                xw_budget_bytes=xw_budget_bytes,
                                single_buffer_residents=True)
    except Exception:
        # Fallback for toolchains where pipeline_mode=pl.Buffered(1) on the
        # resident-weight BlockSpecs is rejected: identical kernel with default
        # (double-buffered) resident blocks. Genuine errors re-raise here.
        return _fastgrnn_pallas(x, W, U, b_z, b_h, zeta, nu,
                                max_chunk=max_chunk,
                                xw_budget_bytes=xw_budget_bytes,
                                single_buffer_residents=False)


def fastgrnn_reference(x, W, U, b_z, b_h, zeta, nu):
    """Pure-JAX f32 reference mirroring the PyTorch forward."""
    B, T, _ = x.shape
    H = W.shape[0]
    h = jnp.zeros((B, H), dtype=jnp.float32)
    for t in range(T):
        x_t = x[:, t, :]
        pre = x_t @ W.T + h @ U.T
        z = jax.nn.sigmoid(pre + b_z)
        h_tilde = jnp.tanh(pre + b_h)
        h = (zeta * (1.0 - z) + nu) * h_tilde + z * h
    return h


if __name__ == "__main__":
    # Shapes consistent with the module's forward: x is (batch, seq_len, input_size)
    batch, seq_len, input_size, hidden_size = 2, 8, 4, 32

    key = jax.random.PRNGKey(0)
    kx, kW, kU, kbz, kbh, kz, kn = jax.random.split(key, 7)

    # Deterministic "reset_parameters": uniform(-stdv, stdv), stdv = 1/sqrt(hidden)
    stdv = 1.0 / (hidden_size ** 0.5)
    W = jax.random.uniform(kW, (hidden_size, input_size), minval=-stdv, maxval=stdv, dtype=jnp.float32)
    U = jax.random.uniform(kU, (hidden_size, hidden_size), minval=-stdv, maxval=stdv, dtype=jnp.float32)
    b_z = jax.random.uniform(kbz, (hidden_size,), minval=-stdv, maxval=stdv, dtype=jnp.float32)
    b_h = jax.random.uniform(kbh, (hidden_size,), minval=-stdv, maxval=stdv, dtype=jnp.float32)
    zeta = jax.random.uniform(kz, (1,), minval=-stdv, maxval=stdv, dtype=jnp.float32)
    nu = jax.random.uniform(kn, (1,), minval=-stdv, maxval=stdv, dtype=jnp.float32)

    x = jax.random.normal(kx, (batch, seq_len, input_size), dtype=jnp.float32)

    ref = fastgrnn_reference(x, W, U, b_z, b_h, zeta[0], nu[0])

    # 1) Default path: whole sequence fits in one time chunk.
    out = fastgrnn_forward(x, W, U, b_z, b_h, zeta, nu)
    out = jax.block_until_ready(out)
    assert out.shape == (batch, hidden_size)
    max_err = jnp.max(jnp.abs(out - ref))
    # Tolerance reflects deliberate bf16 MXU operands (f32 accumulation/carry).
    assert jnp.allclose(out, ref, atol=3e-2, rtol=3e-2), f"max abs err {max_err}"

    # 2) Multi-chunk + time-padding/masking path (Tc=3 -> T_pad=9, last step masked).
    out2 = fastgrnn_forward(x, W, U, b_z, b_h, zeta, nu, max_chunk=3)
    out2 = jax.block_until_ready(out2)
    max_err2 = jnp.max(jnp.abs(out2 - ref))
    assert jnp.allclose(out2, ref, atol=3e-2, rtol=3e-2), f"max abs err {max_err2}"

    print("KERNEL_OK")
</pallas_src>

<mosaic_0001>
module attributes {stable_mosaic.version = 11 : i64} {
  func.func @_fastgrnn_kernel(%arg0: i32, %arg1: i32, %arg2: memref<2xf32, #tpu.memory_space<smem>>, %arg3: memref<1xi32, #tpu.memory_space<smem>>, %arg4: memref<64x4xbf16, #tpu.memory_space<vmem>>, %arg5: memref<4x128xbf16, #tpu.memory_space<vmem>>, %arg6: memref<128x128xbf16, #tpu.memory_space<vmem>>, %arg7: memref<1x128xf32, #tpu.memory_space<vmem>>, %arg8: memref<1x128xf32, #tpu.memory_space<vmem>>, %arg9: memref<8x128xf32, #tpu.memory_space<vmem>>, %arg10: memref<8x128xf32, #tpu.memory_space<vmem>>, %arg11: memref<64x128xf32, #tpu.memory_space<vmem>>) attributes {dimension_semantics = [#tpu.dimension_semantics<parallel>, #tpu.dimension_semantics<arbitrary>], iteration_bounds = array<i64: 1, 1>, scalar_prefetch = 0 : i64, scratch_operands = 2 : i64, tpu.core_type = #tpu.core_type<tc>, window_params = [{transform_indices = @transform_0, window_bounds = array<i64: 2>}, {transform_indices = @transform_1, window_bounds = array<i64: 1>}, {transform_indices = @transform_2, window_bounds = array<i64: 64, 4>}, {pipeline_mode = #tpu.pipeline_mode<synchronous>, transform_indices = @transform_3, window_bounds = array<i64: 4, 128>}, {pipeline_mode = #tpu.pipeline_mode<synchronous>, transform_indices = @transform_4, window_bounds = array<i64: 128, 128>}, {pipeline_mode = #tpu.pipeline_mode<synchronous>, transform_indices = @transform_5, window_bounds = array<i64: 1, 128>}, {pipeline_mode = #tpu.pipeline_mode<synchronous>, transform_indices = @transform_6, window_bounds = array<i64: 1, 128>}, {transform_indices = @transform_7, window_bounds = array<i64: 8, 128>}]} {
    %c0_i32 = arith.constant 0 : i32
    %0 = arith.cmpi eq, %arg1, %c0_i32 : i32
    %1 = arith.extui %0 : i1 to i32
    %c0_i32_0 = arith.constant 0 : i32
    %2 = arith.cmpi ne, %1, %c0_i32_0 : i32
    scf.if %2 {
      %cst_58 = arith.constant 0.000000e+00 : f32
      %179 = vector.broadcast %cst_58 : f32 to vector<8x128xf32>
      %c0_59 = arith.constant 0 : index
      %c0_60 = arith.constant 0 : index
      %180 = vector.load %arg10[%c0_59, %c0_60] : memref<8x128xf32, #tpu.memory_space<vmem>>, vector<8x128xf32>
      tpu.vector_store %arg10[%c0_59, %c0_60], %179 {strides = array<i32>} : memref<8x128xf32, #tpu.memory_space<vmem>>, vector<8x128xf32>,
    } else {
    }
    %c0 = arith.constant 0 : index
    %c0_1 = arith.constant 0 : index
    %3 = vector.load %arg4[%c0, %c0_1] : memref<64x4xbf16, #tpu.memory_space<vmem>>, vector<64x4xbf16>
    %c0_2 = arith.constant 0 : index
    %c0_3 = arith.constant 0 : index
    %4 = vector.load %arg5[%c0_2, %c0_3] : memref<4x128xbf16, #tpu.memory_space<vmem>>, vector<4x128xbf16>
    %cst = arith.constant dense<0.000000e+00> : vector<64x128xf32>
    %5 = tpu.matmul %3, %4, %cst {dimension_numbers = #tpu.dot_dimension_numbers<[1], [0], [0], [1], [0, 0, 1, 1], [], []>} : vector<64x4xbf16>, vector<4x128xbf16>, vector<64x128xf32> -> vector<64x128xf32>
    %c0_4 = arith.constant 0 : index
    %c0_5 = arith.constant 0 : index
    %6 = vector.load %arg11[%c0_4, %c0_5] : memref<64x128xf32, #tpu.memory_space<vmem>>, vector<64x128xf32>
    tpu.vector_store %arg11[%c0_4, %c0_5], %5 {strides = array<i32>} : memref<64x128xf32, #tpu.memory_space<vmem>>, vector<64x128xf32>,
    %c0_6 = arith.constant 0 : index
    %c0_7 = arith.constant 0 : index
    %7 = vector.load %arg7[%c0_6, %c0_7] : memref<1x128xf32, #tpu.memory_space<vmem>>, vector<1x128xf32>
    %8 = vector.shape_cast %7 : vector<1x128xf32> to vector<1x128xf32>
    %9 = vector.broadcast %8 : vector<1x128xf32> to vector<8x128xf32>
    %c0_8 = arith.constant 0 : index
    %c0_9 = arith.constant 0 : index
    %10 = vector.load %arg8[%c0_8, %c0_9] : memref<1x128xf32, #tpu.memory_space<vmem>>, vector<1x128xf32>
    %11 = vector.shape_cast %10 : vector<1x128xf32> to vector<1x128xf32>
    %12 = vector.broadcast %11 : vector<1x128xf32> to vector<8x128xf32>
    %c0_10 = arith.constant 0 : index
    %13 = memref.load %arg2[%c0_10] : memref<2xf32, #tpu.memory_space<smem>>
    %c1 = arith.constant 1 : index
    %14 = memref.load %arg2[%c1] : memref<2xf32, #tpu.memory_space<smem>>
    %15 = arith.addf %13, %14 : f32
    %c0_11 = arith.constant 0 : index
    %c0_12 = arith.constant 0 : index
    %16 = vector.load %arg10[%c0_11, %c0_12] : memref<8x128xf32, #tpu.memory_space<vmem>>, vector<8x128xf32>
    %17 = arith.truncf %16 : vector<8x128xf32> to vector<8x128xbf16>
    %c0_13 = arith.constant 0 : index
    %c0_14 = arith.constant 0 : index
    %18 = vector.load %arg6[%c0_13, %c0_14] : memref<128x128xbf16, #tpu.memory_space<vmem>>, vector<128x128xbf16>
    %cst_15 = arith.constant dense<0.000000e+00> : vector<8x128xf32>
    %19 = tpu.matmul %17, %18, %cst_15 {dimension_numbers = #tpu.dot_dimension_numbers<[1], [0], [0], [1], [0, 0, 1, 1], [], []>} : vector<8x128xbf16>, vector<128x128xbf16>, vector<8x128xf32> -> vector<8x128xf32>
    %c0_16 = arith.constant 0 : index
    %c0_17 = arith.constant 0 : index
    %20 = vector.load %arg11[%c0_16, %c0_17] : memref<64x128xf32, #tpu.memory_space<vmem>>, vector<8x128xf32>
    %21 = arith.addf %20, %19 : vector<8x128xf32>
    %22 = arith.addf %21, %9 : vector<8x128xf32>
    %23 = arith.negf %22 : vector<8x128xf32>
    %24 = math.exp %23 : vector<8x128xf32>
    %cst_18 = arith.constant 1.000000e+00 : f32
    %25 = vector.broadcast %cst_18 : f32 to vector<8x128xf32>
    %26 = arith.addf %25, %24 : vector<8x128xf32>
    %27 = arith.divf %25, %26 : vector<8x128xf32>
    %28 = arith.addf %21, %12 : vector<8x128xf32>
    %29 = math.tanh %28 : vector<8x128xf32>
    %30 = vector.broadcast %13 : f32 to vector<8x128xf32>
    %31 = arith.mulf %30, %27 : vector<8x128xf32>
    %32 = vector.broadcast %15 : f32 to vector<8x128xf32>
    %33 = arith.subf %32, %31 : vector<8x128xf32>
    %34 = arith.mulf %33, %29 : vector<8x128xf32>
    %35 = arith.mulf %27, %16 : vector<8x128xf32>
    %36 = arith.addf %34, %35 : vector<8x128xf32>
    %37 = arith.truncf %36 : vector<8x128xf32> to vector<8x128xbf16>
    %c0_19 = arith.constant 0 : index
    %c0_20 = arith.constant 0 : index
    %38 = vector.load %arg6[%c0_19, %c0_20] : memref<128x128xbf16, #tpu.memory_space<vmem>>, vector<128x128xbf16>
    %cst_21 = arith.constant dense<0.000000e+00> : vector<8x128xf32>
    %39 = tpu.matmul %37, %38, %cst_21 {dimension_numbers = #tpu.dot_dimension_numbers<[1], [0], [0], [1], [0, 0, 1, 1], [], []>} : vector<8x128xbf16>, vector<128x128xbf16>, vector<8x128xf32> -> vector<8x128xf32>
    %c8 = arith.constant 8 : index
    %c0_22 = arith.constant 0 : index
    %40 = vector.load %arg11[%c8, %c0_22] : memref<64x128xf32, #tpu.memory_space<vmem>>, vector<8x128xf32>
    %41 = arith.addf %40, %39 : vector<8x128xf32>
    %42 = arith.addf %41, %9 : vector<8x128xf32>
    %43 = arith.negf %42 : vector<8x128xf32>
    %44 = math.exp %43 : vector<8x128xf32>
    %cst_23 = arith.constant 1.000000e+00 : f32
    %45 = vector.broadcast %cst_23 : f32 to vector<8x128xf32>
    %46 = arith.addf %45, %44 : vector<8x128xf32>
    %47 = arith.divf %45, %46 : vector<8x128xf32>
    %48 = arith.addf %41, %12 : vector<8x128xf32>
    %49 = math.tanh %48 : vector<8x128xf32>
    %50 = vector.broadcast %13 : f32 to vector<8x128xf32>
    %51 = arith.mulf %50, %47 : vector<8x128xf32>
    %52 = vector.broadcast %15 : f32 to vector<8x128xf32>
    %53 = arith.subf %52, %51 : vector<8x128xf32>
    %54 = arith.mulf %53, %49 : vector<8x128xf32>
    %55 = arith.mulf %47, %36 : vector<8x128xf32>
    %56 = arith.addf %54, %55 : vector<8x128xf32>
    %57 = arith.truncf %56 : vector<8x128xf32> to vector<8x128xbf16>
    %c0_24 = arith.constant 0 : index
    %c0_25 = arith.constant 0 : index
    %58 = vector.load %arg6[%c0_24, %c0_25] : memref<128x128xbf16, #tpu.memory_space<vmem>>, vector<128x128xbf16>
    %cst_26 = arith.constant dense<0.000000e+00> : vector<8x128xf32>
    %59 = tpu.matmul %57, %58, %cst_26 {dimension_numbers = #tpu.dot_dimension_numbers<[1], [0], [0], [1], [0, 0, 1, 1], [], []>} : vector<8x128xbf16>, vector<128x128xbf16>, vector<8x128xf32> -> vector<8x128xf32>
    %c16 = arith.constant 16 : index
    %c0_27 = arith.constant 0 : index
    %60 = vector.load %arg11[%c16, %c0_27] : memref<64x128xf32, #tpu.memory_space<vmem>>, vector<8x128xf32>
    %61 = arith.addf %60, %59 : vector<8x128xf32>
    %62 = arith.addf %61, %9 : vector<8x128xf32>
    %63 = arith.negf %62 : vector<8x128xf32>
    %64 = math.exp %63 : vector<8x128xf32>
    %cst_28 = arith.constant 1.000000e+00 : f32
    %65 = vector.broadcast %cst_28 : f32 to vector<8x128xf32>
    %66 = arith.addf %65, %64 : vector<8x128xf32>
    %67 = arith.divf %65, %66 : vector<8x128xf32>
    %68 = arith.addf %61, %12 : vector<8x128xf32>
    %69 = math.tanh %68 : vector<8x128xf32>
    %70 = vector.broadcast %13 : f32 to vector<8x128xf32>
    %71 = arith.mulf %70, %67 : vector<8x128xf32>
    %72 = vector.broadcast %15 : f32 to vector<8x128xf32>
    %73 = arith.subf %72, %71 : vector<8x128xf32>
    %74 = arith.mulf %73, %69 : vector<8x128xf32>
    %75 = arith.mulf %67, %56 : vector<8x128xf32>
    %76 = arith.addf %74, %75 : vector<8x128xf32>
    %77 = arith.truncf %76 : vector<8x128xf32> to vector<8x128xbf16>
    %c0_29 = arith.constant 0 : index
    %c0_30 = arith.constant 0 : index
    %78 = vector.load %arg6[%c0_29, %c0_30] : memref<128x128xbf16, #tpu.memory_space<vmem>>, vector<128x128xbf16>
    %cst_31 = arith.constant dense<0.000000e+00> : vector<8x128xf32>
    %79 = tpu.matmul %77, %78, %cst_31 {dimension_numbers = #tpu.dot_dimension_numbers<[1], [0], [0], [1], [0, 0, 1, 1], [], []>} : vector<8x128xbf16>, vector<128x128xbf16>, vector<8x128xf32> -> vector<8x128xf32>
    %c24 = arith.constant 24 : index
    %c0_32 = arith.constant 0 : index
    %80 = vector.load %arg11[%c24, %c0_32] : memref<64x128xf32, #tpu.memory_space<vmem>>, vector<8x128xf32>
    %81 = arith.addf %80, %79 : vector<8x128xf32>
    %82 = arith.addf %81, %9 : vector<8x128xf32>
    %83 = arith.negf %82 : vector<8x128xf32>
    %84 = math.exp %83 : vector<8x128xf32>
    %cst_33 = arith.constant 1.000000e+00 : f32
    %85 = vector.broadcast %cst_33 : f32 to vector<8x128xf32>
    %86 = arith.addf %85, %84 : vector<8x128xf32>
    %87 = arith.divf %85, %86 : vector<8x128xf32>
    %88 = arith.addf %81, %12 : vector<8x128xf32>
    %89 = math.tanh %88 : vector<8x128xf32>
    %90 = vector.broadcast %13 : f32 to vector<8x128xf32>
    %91 = arith.mulf %90, %87 : vector<8x128xf32>
    %92 = vector.broadcast %15 : f32 to vector<8x128xf32>
    %93 = arith.subf %92, %91 : vector<8x128xf32>
    %94 = arith.mulf %93, %89 : vector<8x128xf32>
    %95 = arith.mulf %87, %76 : vector<8x128xf32>
    %96 = arith.addf %94, %95 : vector<8x128xf32>
    %97 = arith.truncf %96 : vector<8x128xf32> to vector<8x128xbf16>
    %c0_34 = arith.constant 0 : index
    %c0_35 = arith.constant 0 : index
    %98 = vector.load %arg6[%c0_34, %c0_35] : memref<128x128xbf16, #tpu.memory_space<vmem>>, vector<128x128xbf16>
    %cst_36 = arith.constant dense<0.000000e+00> : vector<8x128xf32>
    %99 = tpu.matmul %97, %98, %cst_36 {dimension_numbers = #tpu.dot_dimension_numbers<[1], [0], [0], [1], [0, 0, 1, 1], [], []>} : vector<8x128xbf16>, vector<128x128xbf16>, vector<8x128xf32> -> vector<8x128xf32>
    %c32 = arith.constant 32 : index
    %c0_37 = arith.constant 0 : index
    %100 = vector.load %arg11[%c32, %c0_37] : memref<64x128xf32, #tpu.memory_space<vmem>>, vector<8x128xf32>
    %101 = arith.addf %100, %99 : vector<8x128xf32>
    %102 = arith.addf %101, %9 : vector<8x128xf32>
    %103 = arith.negf %102 : vector<8x128xf32>
    %104 = math.exp %103 : vector<8x128xf32>
    %cst_38 = arith.constant 1.000000e+00 : f32
    %105 = vector.broadcast %cst_38 : f32 to vector<8x128xf32>
    %106 = arith.addf %105, %104 : vector<8x128xf32>
    %107 = arith.divf %105, %106 : vector<8x128xf32>
    %108 = arith.addf %101, %12 : vector<8x128xf32>
    %109 = math.tanh %108 : vector<8x128xf32>
    %110 = vector.broadcast %13 : f32 to vector<8x128xf32>
    %111 = arith.mulf %110, %107 : vector<8x128xf32>
    %112 = vector.broadcast %15 : f32 to vector<8x128xf32>
    %113 = arith.subf %112, %111 : vector<8x128xf32>
    %114 = arith.mulf %113, %109 : vector<8x128xf32>
    %115 = arith.mulf %107, %96 : vector<8x128xf32>
    %116 = arith.addf %114, %115 : vector<8x128xf32>
    %117 = arith.truncf %116 : vector<8x128xf32> to vector<8x128xbf16>
    %c0_39 = arith.constant 0 : index
    %c0_40 = arith.constant 0 : index
    %118 = vector.load %arg6[%c0_39, %c0_40] : memref<128x128xbf16, #tpu.memory_space<vmem>>, vector<128x128xbf16>
    %cst_41 = arith.constant dense<0.000000e+00> : vector<8x128xf32>
    %119 = tpu.matmul %117, %118, %cst_41 {dimension_numbers = #tpu.dot_dimension_numbers<[1], [0], [0], [1], [0, 0, 1, 1], [], []>} : vector<8x128xbf16>, vector<128x128xbf16>, vector<8x128xf32> -> vector<8x128xf32>
    %c40 = arith.constant 40 : index
    %c0_42 = arith.constant 0 : index
    %120 = vector.load %arg11[%c40, %c0_42] : memref<64x128xf32, #tpu.memory_space<vmem>>, vector<8x128xf32>
    %121 = arith.addf %120, %119 : vector<8x128xf32>
    %122 = arith.addf %121, %9 : vector<8x128xf32>
    %123 = arith.negf %122 : vector<8x128xf32>
    %124 = math.exp %123 : vector<8x128xf32>
    %cst_43 = arith.constant 1.000000e+00 : f32
    %125 = vector.broadcast %cst_43 : f32 to vector<8x128xf32>
    %126 = arith.addf %125, %124 : vector<8x128xf32>
    %127 = arith.divf %125, %126 : vector<8x128xf32>
    %128 = arith.addf %121, %12 : vector<8x128xf32>
    %129 = math.tanh %128 : vector<8x128xf32>
    %130 = vector.broadcast %13 : f32 to vector<8x128xf32>
    %131 = arith.mulf %130, %127 : vector<8x128xf32>
    %132 = vector.broadcast %15 : f32 to vector<8x128xf32>
    %133 = arith.subf %132, %131 : vector<8x128xf32>
    %134 = arith.mulf %133, %129 : vector<8x128xf32>
    %135 = arith.mulf %127, %116 : vector<8x128xf32>
    %136 = arith.addf %134, %135 : vector<8x128xf32>
    %137 = arith.truncf %136 : vector<8x128xf32> to vector<8x128xbf16>
    %c0_44 = arith.constant 0 : index
    %c0_45 = arith.constant 0 : index
    %138 = vector.load %arg6[%c0_44, %c0_45] : memref<128x128xbf16, #tpu.memory_space<vmem>>, vector<128x128xbf16>
    %cst_46 = arith.constant dense<0.000000e+00> : vector<8x128xf32>
    %139 = tpu.matmul %137, %138, %cst_46 {dimension_numbers = #tpu.dot_dimension_numbers<[1], [0], [0], [1], [0, 0, 1, 1], [], []>} : vector<8x128xbf16>, vector<128x128xbf16>, vector<8x128xf32> -> vector<8x128xf32>
    %c48 = arith.constant 48 : index
    %c0_47 = arith.constant 0 : index
    %140 = vector.load %arg11[%c48, %c0_47] : memref<64x128xf32, #tpu.memory_space<vmem>>, vector<8x128xf32>
    %141 = arith.addf %140, %139 : vector<8x128xf32>
    %142 = arith.addf %141, %9 : vector<8x128xf32>
    %143 = arith.negf %142 : vector<8x128xf32>
    %144 = math.exp %143 : vector<8x128xf32>
    %cst_48 = arith.constant 1.000000e+00 : f32
    %145 = vector.broadcast %cst_48 : f32 to vector<8x128xf32>
    %146 = arith.addf %145, %144 : vector<8x128xf32>
    %147 = arith.divf %145, %146 : vector<8x128xf32>
    %148 = arith.addf %141, %12 : vector<8x128xf32>
    %149 = math.tanh %148 : vector<8x128xf32>
    %150 = vector.broadcast %13 : f32 to vector<8x128xf32>
    %151 = arith.mulf %150, %147 : vector<8x128xf32>
    %152 = vector.broadcast %15 : f32 to vector<8x128xf32>
    %153 = arith.subf %152, %151 : vector<8x128xf32>
    %154 = arith.mulf %153, %149 : vector<8x128xf32>
    %155 = arith.mulf %147, %136 : vector<8x128xf32>
    %156 = arith.addf %154, %155 : vector<8x128xf32>
    %157 = arith.truncf %156 : vector<8x128xf32> to vector<8x128xbf16>
    %c0_49 = arith.constant 0 : index
    %c0_50 = arith.constant 0 : index
    %158 = vector.load %arg6[%c0_49, %c0_50] : memref<128x128xbf16, #tpu.memory_space<vmem>>, vector<128x128xbf16>
    %cst_51 = arith.constant dense<0.000000e+00> : vector<8x128xf32>
    %159 = tpu.matmul %157, %158, %cst_51 {dimension_numbers = #tpu.dot_dimension_numbers<[1], [0], [0], [1], [0, 0, 1, 1], [], []>} : vector<8x128xbf16>, vector<128x128xbf16>, vector<8x128xf32> -> vector<8x128xf32>
    %c56 = arith.constant 56 : index
    %c0_52 = arith.constant 0 : index
    %160 = vector.load %arg11[%c56, %c0_52] : memref<64x128xf32, #tpu.memory_space<vmem>>, vector<8x128xf32>
    %161 = arith.addf %160, %159 : vector<8x128xf32>
    %162 = arith.addf %161, %9 : vector<8x128xf32>
    %163 = arith.negf %162 : vector<8x128xf32>
    %164 = math.exp %163 : vector<8x128xf32>
    %cst_53 = arith.constant 1.000000e+00 : f32
    %165 = vector.broadcast %cst_53 : f32 to vector<8x128xf32>
    %166 = arith.addf %165, %164 : vector<8x128xf32>
    %167 = arith.divf %165, %166 : vector<8x128xf32>
    %168 = arith.addf %161, %12 : vector<8x128xf32>
    %169 = math.tanh %168 : vector<8x128xf32>
    %170 = vector.broadcast %13 : f32 to vector<8x128xf32>
    %171 = arith.mulf %170, %167 : vector<8x128xf32>
    %172 = vector.broadcast %15 : f32 to vector<8x128xf32>
    %173 = arith.subf %172, %171 : vector<8x128xf32>
    %174 = arith.mulf %173, %169 : vector<8x128xf32>
    %175 = arith.mulf %167, %156 : vector<8x128xf32>
    %176 = arith.addf %174, %175 : vector<8x128xf32>
    %c0_54 = arith.constant 0 : index
    %c0_55 = arith.constant 0 : index
    %177 = vector.load %arg10[%c0_54, %c0_55] : memref<8x128xf32, #tpu.memory_space<vmem>>, vector<8x128xf32>
    tpu.vector_store %arg10[%c0_54, %c0_55], %176 {strides = array<i32>} : memref<8x128xf32, #tpu.memory_space<vmem>>, vector<8x128xf32>,
    %c0_56 = arith.constant 0 : index
    %c0_57 = arith.constant 0 : index
    %178 = vector.load %arg9[%c0_56, %c0_57] : memref<8x128xf32, #tpu.memory_space<vmem>>, vector<8x128xf32>
    tpu.vector_store %arg9[%c0_56, %c0_57], %176 {strides = array<i32>} : memref<8x128xf32, #tpu.memory_space<vmem>>, vector<8x128xf32>,
    return
  }
  func.func @transform_0(%arg0: i32, %arg1: i32) -> i32 {
    %c0_i32 = arith.constant 0 : i32
    %c0_i32_0 = arith.constant 0 : i32
    return %c0_i32 : i32
  }
  func.func @transform_1(%arg0: i32, %arg1: i32) -> i32 {
    %c0_i32 = arith.constant 0 : i32
    %c0_i32_0 = arith.constant 0 : i32
    return %c0_i32 : i32
  }
  func.func @transform_2(%arg0: i32, %arg1: i32) -> (i32, i32) {
    %c1_i32 = arith.constant 1 : i32
    %0 = arith.muli %arg1, %c1_i32 : i32
    %1 = arith.addi %0, %arg0 : i32
    %c0_i32 = arith.constant 0 : i32
    %c0_i32_0 = arith.constant 0 : i32
    return %1, %c0_i32 : i32, i32
  }
  func.func @transform_3(%arg0: i32, %arg1: i32) -> (i32, i32) {
    %c0_i32 = arith.constant 0 : i32
    %c0_i32_0 = arith.constant 0 : i32
    %c0_i32_1 = arith.constant 0 : i32
    return %c0_i32, %c0_i32_0 : i32, i32
  }
  func.func @transform_4(%arg0: i32, %arg1: i32) -> (i32, i32) {
    %c0_i32 = arith.constant 0 : i32
    %c0_i32_0 = arith.constant 0 : i32
    %c0_i32_1 = arith.constant 0 : i32
    return %c0_i32, %c0_i32_0 : i32, i32
  }
  func.func @transform_5(%arg0: i32, %arg1: i32) -> (i32, i32) {
    %c0_i32 = arith.constant 0 : i32
    %c0_i32_0 = arith.constant 0 : i32
    %c0_i32_1 = arith.constant 0 : i32
    return %c0_i32, %c0_i32_0 : i32, i32
  }
  func.func @transform_6(%arg0: i32, %arg1: i32) -> (i32, i32) {
    %c0_i32 = arith.constant 0 : i32
    %c0_i32_0 = arith.constant 0 : i32
    %c0_i32_1 = arith.constant 0 : i32
    return %c0_i32, %c0_i32_0 : i32, i32
  }
  func.func @transform_7(%arg0: i32, %arg1: i32) -> (i32, i32) {
    %c0_i32 = arith.constant 0 : i32
    %c0_i32_0 = arith.constant 0 : i32
    return %arg0, %c0_i32 : i32, i32
  }
}

module attributes {stable_mosaic.version = 11 : i64} {
  func.func @_fastgrnn_kernel(%arg0: i32, %arg1: i32, %arg2: memref<2xf32, #tpu.memory_space<smem>>, %arg3: memref<1xi32, #tpu.memory_space<smem>>, %arg4: memref<64x4xbf16, #tpu.memory_space<vmem>>, %arg5: memref<4x128xbf16, #tpu.memory_space<vmem>>, %arg6: memref<128x128xbf16, #tpu.memory_space<vmem>>, %arg7: memref<1x128xf32, #tpu.memory_space<vmem>>, %arg8: memref<1x128xf32, #tpu.memory_space<vmem>>, %arg9: memref<8x128xf32, #tpu.memory_space<vmem>>, %arg10: memref<8x128xf32, #tpu.memory_space<vmem>>, %arg11: memref<64x128xf32, #tpu.memory_space<vmem>>) attributes {dimension_semantics = [#tpu.dimension_semantics<parallel>, #tpu.dimension_semantics<arbitrary>], iteration_bounds = array<i64: 1, 1>, scalar_prefetch = 0 : i64, scratch_operands = 2 : i64, tpu.core_type = #tpu.core_type<tc>, window_params = [{transform_indices = @transform_0, window_bounds = array<i64: 2>}, {transform_indices = @transform_1, window_bounds = array<i64: 1>}, {transform_indices = @transform_2, window_bounds = array<i64: 64, 4>}, {pipeline_mode = #tpu.pipeline_mode<synchronous>, transform_indices = @transform_3, window_bounds = array<i64: 4, 128>}, {pipeline_mode = #tpu.pipeline_mode<synchronous>, transform_indices = @transform_4, window_bounds = array<i64: 128, 128>}, {pipeline_mode = #tpu.pipeline_mode<synchronous>, transform_indices = @transform_5, window_bounds = array<i64: 1, 128>}, {pipeline_mode = #tpu.pipeline_mode<synchronous>, transform_indices = @transform_6, window_bounds = array<i64: 1, 128>}, {transform_indices = @transform_7, window_bounds = array<i64: 8, 128>}]} {
    %c0_i32 = arith.constant 0 : i32
    %0 = arith.cmpi eq, %arg1, %c0_i32 : i32
    %1 = arith.extui %0 : i1 to i32
    %c0_i32_0 = arith.constant 0 : i32
    %2 = arith.cmpi ne, %1, %c0_i32_0 : i32
    scf.if %2 {
      %cst_58 = arith.constant 0.000000e+00 : f32
      %179 = vector.broadcast %cst_58 : f32 to vector<8x128xf32>
      %c0_59 = arith.constant 0 : index
      %c0_60 = arith.constant 0 : index
      %180 = vector.load %arg10[%c0_59, %c0_60] : memref<8x128xf32, #tpu.memory_space<vmem>>, vector<8x128xf32>
      tpu.vector_store %arg10[%c0_59, %c0_60], %179 {strides = array<i32>} : memref<8x128xf32, #tpu.memory_space<vmem>>, vector<8x128xf32>,
    } else {
    }
    %c0 = arith.constant 0 : index
    %c0_1 = arith.constant 0 : index
    %3 = vector.load %arg4[%c0, %c0_1] : memref<64x4xbf16, #tpu.memory_space<vmem>>, vector<64x4xbf16>
    %c0_2 = arith.constant 0 : index
    %c0_3 = arith.constant 0 : index
    %4 = vector.load %arg5[%c0_2, %c0_3] : memref<4x128xbf16, #tpu.memory_space<vmem>>, vector<4x128xbf16>
    %cst = arith.constant dense<0.000000e+00> : vector<64x128xf32>
    %5 = tpu.matmul %3, %4, %cst {dimension_numbers = #tpu.dot_dimension_numbers<[1], [0], [0], [1], [0, 0, 1, 1], [], []>} : vector<64x4xbf16>, vector<4x128xbf16>, vector<64x128xf32> -> vector<64x128xf32>
    %c0_4 = arith.constant 0 : index
    %c0_5 = arith.constant 0 : index
    %6 = vector.load %arg11[%c0_4, %c0_5] : memref<64x128xf32, #tpu.memory_space<vmem>>, vector<64x128xf32>
    tpu.vector_store %arg11[%c0_4, %c0_5], %5 {strides = array<i32>} : memref<64x128xf32, #tpu.memory_space<vmem>>, vector<64x128xf32>,
    %c0_6 = arith.constant 0 : index
    %c0_7 = arith.constant 0 : index
    %7 = vector.load %arg7[%c0_6, %c0_7] : memref<1x128xf32, #tpu.memory_space<vmem>>, vector<1x128xf32>
    %8 = vector.shape_cast %7 : vector<1x128xf32> to vector<1x128xf32>
    %9 = vector.broadcast %8 : vector<1x128xf32> to vector<8x128xf32>
    %c0_8 = arith.constant 0 : index
    %c0_9 = arith.constant 0 : index
    %10 = vector.load %arg8[%c0_8, %c0_9] : memref<1x128xf32, #tpu.memory_space<vmem>>, vector<1x128xf32>
    %11 = vector.shape_cast %10 : vector<1x128xf32> to vector<1x128xf32>
    %12 = vector.broadcast %11 : vector<1x128xf32> to vector<8x128xf32>
    %c0_10 = arith.constant 0 : index
    %13 = memref.load %arg2[%c0_10] : memref<2xf32, #tpu.memory_space<smem>>
    %c1 = arith.constant 1 : index
    %14 = memref.load %arg2[%c1] : memref<2xf32, #tpu.memory_space<smem>>
    %15 = arith.addf %13, %14 : f32
    %c0_11 = arith.constant 0 : index
    %c0_12 = arith.constant 0 : index
    %16 = vector.load %arg10[%c0_11, %c0_12] : memref<8x128xf32, #tpu.memory_space<vmem>>, vector<8x128xf32>
    %17 = arith.truncf %16 : vector<8x128xf32> to vector<8x128xbf16>
    %c0_13 = arith.constant 0 : index
    %c0_14 = arith.constant 0 : index
    %18 = vector.load %arg6[%c0_13, %c0_14] : memref<128x128xbf16, #tpu.memory_space<vmem>>, vector<128x128xbf16>
    %cst_15 = arith.constant dense<0.000000e+00> : vector<8x128xf32>
    %19 = tpu.matmul %17, %18, %cst_15 {dimension_numbers = #tpu.dot_dimension_numbers<[1], [0], [0], [1], [0, 0, 1, 1], [], []>} : vector<8x128xbf16>, vector<128x128xbf16>, vector<8x128xf32> -> vector<8x128xf32>
    %c0_16 = arith.constant 0 : index
    %c0_17 = arith.constant 0 : index
    %20 = vector.load %arg11[%c0_16, %c0_17] : memref<64x128xf32, #tpu.memory_space<vmem>>, vector<8x128xf32>
    %21 = arith.addf %20, %19 : vector<8x128xf32>
    %22 = arith.addf %21, %9 : vector<8x128xf32>
    %23 = arith.negf %22 : vector<8x128xf32>
    %24 = math.exp %23 : vector<8x128xf32>
    %cst_18 = arith.constant 1.000000e+00 : f32
    %25 = vector.broadcast %cst_18 : f32 to vector<8x128xf32>
    %26 = arith.addf %25, %24 : vector<8x128xf32>
    %27 = arith.divf %25, %26 : vector<8x128xf32>
    %28 = arith.addf %21, %12 : vector<8x128xf32>
    %29 = math.tanh %28 : vector<8x128xf32>
    %30 = vector.broadcast %13 : f32 to vector<8x128xf32>
    %31 = arith.mulf %30, %27 : vector<8x128xf32>
    %32 = vector.broadcast %15 : f32 to vector<8x128xf32>
    %33 = arith.subf %32, %31 : vector<8x128xf32>
    %34 = arith.mulf %33, %29 : vector<8x128xf32>
    %35 = arith.mulf %27, %16 : vector<8x128xf32>
    %36 = arith.addf %34, %35 : vector<8x128xf32>
    %37 = arith.truncf %36 : vector<8x128xf32> to vector<8x128xbf16>
    %c0_19 = arith.constant 0 : index
    %c0_20 = arith.constant 0 : index
    %38 = vector.load %arg6[%c0_19, %c0_20] : memref<128x128xbf16, #tpu.memory_space<vmem>>, vector<128x128xbf16>
    %cst_21 = arith.constant dense<0.000000e+00> : vector<8x128xf32>
    %39 = tpu.matmul %37, %38, %cst_21 {dimension_numbers = #tpu.dot_dimension_numbers<[1], [0], [0], [1], [0, 0, 1, 1], [], []>} : vector<8x128xbf16>, vector<128x128xbf16>, vector<8x128xf32> -> vector<8x128xf32>
    %c8 = arith.constant 8 : index
    %c0_22 = arith.constant 0 : index
    %40 = vector.load %arg11[%c8, %c0_22] : memref<64x128xf32, #tpu.memory_space<vmem>>, vector<8x128xf32>
    %41 = arith.addf %40, %39 : vector<8x128xf32>
    %42 = arith.addf %41, %9 : vector<8x128xf32>
    %43 = arith.negf %42 : vector<8x128xf32>
    %44 = math.exp %43 : vector<8x128xf32>
    %cst_23 = arith.constant 1.000000e+00 : f32
    %45 = vector.broadcast %cst_23 : f32 to vector<8x128xf32>
    %46 = arith.addf %45, %44 : vector<8x128xf32>
    %47 = arith.divf %45, %46 : vector<8x128xf32>
    %48 = arith.addf %41, %12 : vector<8x128xf32>
    %49 = math.tanh %48 : vector<8x128xf32>
    %50 = vector.broadcast %13 : f32 to vector<8x128xf32>
    %51 = arith.mulf %50, %47 : vector<8x128xf32>
    %52 = vector.broadcast %15 : f32 to vector<8x128xf32>
    %53 = arith.subf %52, %51 : vector<8x128xf32>
    %54 = arith.mulf %53, %49 : vector<8x128xf32>
    %55 = arith.mulf %47, %36 : vector<8x128xf32>
    %56 = arith.addf %54, %55 : vector<8x128xf32>
    %57 = arith.truncf %56 : vector<8x128xf32> to vector<8x128xbf16>
    %c0_24 = arith.constant 0 : index
    %c0_25 = arith.constant 0 : index
    %58 = vector.load %arg6[%c0_24, %c0_25] : memref<128x128xbf16, #tpu.memory_space<vmem>>, vector<128x128xbf16>
    %cst_26 = arith.constant dense<0.000000e+00> : vector<8x128xf32>
    %59 = tpu.matmul %57, %58, %cst_26 {dimension_numbers = #tpu.dot_dimension_numbers<[1], [0], [0], [1], [0, 0, 1, 1], [], []>} : vector<8x128xbf16>, vector<128x128xbf16>, vector<8x128xf32> -> vector<8x128xf32>
    %c16 = arith.constant 16 : index
    %c0_27 = arith.constant 0 : index
    %60 = vector.load %arg11[%c16, %c0_27] : memref<64x128xf32, #tpu.memory_space<vmem>>, vector<8x128xf32>
    %61 = arith.addf %60, %59 : vector<8x128xf32>
    %62 = arith.addf %61, %9 : vector<8x128xf32>
    %63 = arith.negf %62 : vector<8x128xf32>
    %64 = math.exp %63 : vector<8x128xf32>
    %cst_28 = arith.constant 1.000000e+00 : f32
    %65 = vector.broadcast %cst_28 : f32 to vector<8x128xf32>
    %66 = arith.addf %65, %64 : vector<8x128xf32>
    %67 = arith.divf %65, %66 : vector<8x128xf32>
    %68 = arith.addf %61, %12 : vector<8x128xf32>
    %69 = math.tanh %68 : vector<8x128xf32>
    %70 = vector.broadcast %13 : f32 to vector<8x128xf32>
    %71 = arith.mulf %70, %67 : vector<8x128xf32>
    %72 = vector.broadcast %15 : f32 to vector<8x128xf32>
    %73 = arith.subf %72, %71 : vector<8x128xf32>
    %74 = arith.mulf %73, %69 : vector<8x128xf32>
    %75 = arith.mulf %67, %56 : vector<8x128xf32>
    %76 = arith.addf %74, %75 : vector<8x128xf32>
    %77 = arith.truncf %76 : vector<8x128xf32> to vector<8x128xbf16>
    %c0_29 = arith.constant 0 : index
    %c0_30 = arith.constant 0 : index
    %78 = vector.load %arg6[%c0_29, %c0_30] : memref<128x128xbf16, #tpu.memory_space<vmem>>, vector<128x128xbf16>
    %cst_31 = arith.constant dense<0.000000e+00> : vector<8x128xf32>
    %79 = tpu.matmul %77, %78, %cst_31 {dimension_numbers = #tpu.dot_dimension_numbers<[1], [0], [0], [1], [0, 0, 1, 1], [], []>} : vector<8x128xbf16>, vector<128x128xbf16>, vector<8x128xf32> -> vector<8x128xf32>
    %c24 = arith.constant 24 : index
    %c0_32 = arith.constant 0 : index
    %80 = vector.load %arg11[%c24, %c0_32] : memref<64x128xf32, #tpu.memory_space<vmem>>, vector<8x128xf32>
    %81 = arith.addf %80, %79 : vector<8x128xf32>
    %82 = arith.addf %81, %9 : vector<8x128xf32>
    %83 = arith.negf %82 : vector<8x128xf32>
    %84 = math.exp %83 : vector<8x128xf32>
    %cst_33 = arith.constant 1.000000e+00 : f32
    %85 = vector.broadcast %cst_33 : f32 to vector<8x128xf32>
    %86 = arith.addf %85, %84 : vector<8x128xf32>
    %87 = arith.divf %85, %86 : vector<8x128xf32>
    %88 = arith.addf %81, %12 : vector<8x128xf32>
    %89 = math.tanh %88 : vector<8x128xf32>
    %90 = vector.broadcast %13 : f32 to vector<8x128xf32>
    %91 = arith.mulf %90, %87 : vector<8x128xf32>
    %92 = vector.broadcast %15 : f32 to vector<8x128xf32>
    %93 = arith.subf %92, %91 : vector<8x128xf32>
    %94 = arith.mulf %93, %89 : vector<8x128xf32>
    %95 = arith.mulf %87, %76 : vector<8x128xf32>
    %96 = arith.addf %94, %95 : vector<8x128xf32>
    %97 = arith.truncf %96 : vector<8x128xf32> to vector<8x128xbf16>
    %c0_34 = arith.constant 0 : index
    %c0_35 = arith.constant 0 : index
    %98 = vector.load %arg6[%c0_34, %c0_35] : memref<128x128xbf16, #tpu.memory_space<vmem>>, vector<128x128xbf16>
    %cst_36 = arith.constant dense<0.000000e+00> : vector<8x128xf32>
    %99 = tpu.matmul %97, %98, %cst_36 {dimension_numbers = #tpu.dot_dimension_numbers<[1], [0], [0], [1], [0, 0, 1, 1], [], []>} : vector<8x128xbf16>, vector<128x128xbf16>, vector<8x128xf32> -> vector<8x128xf32>
    %c32 = arith.constant 32 : index
    %c0_37 = arith.constant 0 : index
    %100 = vector.load %arg11[%c32, %c0_37] : memref<64x128xf32, #tpu.memory_space<vmem>>, vector<8x128xf32>
    %101 = arith.addf %100, %99 : vector<8x128xf32>
    %102 = arith.addf %101, %9 : vector<8x128xf32>
    %103 = arith.negf %102 : vector<8x128xf32>
    %104 = math.exp %103 : vector<8x128xf32>
    %cst_38 = arith.constant 1.000000e+00 : f32
    %105 = vector.broadcast %cst_38 : f32 to vector<8x128xf32>
    %106 = arith.addf %105, %104 : vector<8x128xf32>
    %107 = arith.divf %105, %106 : vector<8x128xf32>
    %108 = arith.addf %101, %12 : vector<8x128xf32>
    %109 = math.tanh %108 : vector<8x128xf32>
    %110 = vector.broadcast %13 : f32 to vector<8x128xf32>
    %111 = arith.mulf %110, %107 : vector<8x128xf32>
    %112 = vector.broadcast %15 : f32 to vector<8x128xf32>
    %113 = arith.subf %112, %111 : vector<8x128xf32>
    %114 = arith.mulf %113, %109 : vector<8x128xf32>
    %115 = arith.mulf %107, %96 : vector<8x128xf32>
    %116 = arith.addf %114, %115 : vector<8x128xf32>
    %117 = arith.truncf %116 : vector<8x128xf32> to vector<8x128xbf16>
    %c0_39 = arith.constant 0 : index
    %c0_40 = arith.constant 0 : index
    %118 = vector.load %arg6[%c0_39, %c0_40] : memref<128x128xbf16, #tpu.memory_space<vmem>>, vector<128x128xbf16>
    %cst_41 = arith.constant dense<0.000000e+00> : vector<8x128xf32>
    %119 = tpu.matmul %117, %118, %cst_41 {dimension_numbers = #tpu.dot_dimension_numbers<[1], [0], [0], [1], [0, 0, 1, 1], [], []>} : vector<8x128xbf16>, vector<128x128xbf16>, vector<8x128xf32> -> vector<8x128xf32>
    %c40 = arith.constant 40 : index
    %c0_42 = arith.constant 0 : index
    %120 = vector.load %arg11[%c40, %c0_42] : memref<64x128xf32, #tpu.memory_space<vmem>>, vector<8x128xf32>
    %121 = arith.addf %120, %119 : vector<8x128xf32>
    %122 = arith.addf %121, %9 : vector<8x128xf32>
    %123 = arith.negf %122 : vector<8x128xf32>
    %124 = math.exp %123 : vector<8x128xf32>
    %cst_43 = arith.constant 1.000000e+00 : f32
    %125 = vector.broadcast %cst_43 : f32 to vector<8x128xf32>
    %126 = arith.addf %125, %124 : vector<8x128xf32>
    %127 = arith.divf %125, %126 : vector<8x128xf32>
    %128 = arith.addf %121, %12 : vector<8x128xf32>
    %129 = math.tanh %128 : vector<8x128xf32>
    %130 = vector.broadcast %13 : f32 to vector<8x128xf32>
    %131 = arith.mulf %130, %127 : vector<8x128xf32>
    %132 = vector.broadcast %15 : f32 to vector<8x128xf32>
    %133 = arith.subf %132, %131 : vector<8x128xf32>
    %134 = arith.mulf %133, %129 : vector<8x128xf32>
    %135 = arith.mulf %127, %116 : vector<8x128xf32>
    %136 = arith.addf %134, %135 : vector<8x128xf32>
    %137 = arith.truncf %136 : vector<8x128xf32> to vector<8x128xbf16>
    %c0_44 = arith.constant 0 : index
    %c0_45 = arith.constant 0 : index
    %138 = vector.load %arg6[%c0_44, %c0_45] : memref<128x128xbf16, #tpu.memory_space<vmem>>, vector<128x128xbf16>
    %cst_46 = arith.constant dense<0.000000e+00> : vector<8x128xf32>
    %139 = tpu.matmul %137, %138, %cst_46 {dimension_numbers = #tpu.dot_dimension_numbers<[1], [0], [0], [1], [0, 0, 1, 1], [], []>} : vector<8x128xbf16>, vector<128x128xbf16>, vector<8x128xf32> -> vector<8x128xf32>
    %c48 = arith.constant 48 : index
    %c0_47 = arith.constant 0 : index
    %140 = vector.load %arg11[%c48, %c0_47] : memref<64x128xf32, #tpu.memory_space<vmem>>, vector<8x128xf32>
    %141 = arith.addf %140, %139 : vector<8x128xf32>
    %142 = arith.addf %141, %9 : vector<8x128xf32>
    %143 = arith.negf %142 : vector<8x128xf32>
    %144 = math.exp %143 : vector<8x128xf32>
    %cst_48 = arith.constant 1.000000e+00 : f32
    %145 = vector.broadcast %cst_48 : f32 to vector<8x128xf32>
    %146 = arith.addf %145, %144 : vector<8x128xf32>
    %147 = arith.divf %145, %146 : vector<8x128xf32>
    %148 = arith.addf %141, %12 : vector<8x128xf32>
    %149 = math.tanh %148 : vector<8x128xf32>
    %150 = vector.broadcast %13 : f32 to vector<8x128xf32>
    %151 = arith.mulf %150, %147 : vector<8x128xf32>
    %152 = vector.broadcast %15 : f32 to vector<8x128xf32>
    %153 = arith.subf %152, %151 : vector<8x128xf32>
    %154 = arith.mulf %153, %149 : vector<8x128xf32>
    %155 = arith.mulf %147, %136 : vector<8x128xf32>
    %156 = arith.addf %154, %155 : vector<8x128xf32>
    %157 = arith.truncf %156 : vector<8x128xf32> to vector<8x128xbf16>
    %c0_49 = arith.constant 0 : index
    %c0_50 = arith.constant 0 : index
    %158 = vector.load %arg6[%c0_49, %c0_50] : memref<128x128xbf16, #tpu.memory_space<vmem>>, vector<128x128xbf16>
    %cst_51 = arith.constant dense<0.000000e+00> : vector<8x128xf32>
    %159 = tpu.matmul %157, %158, %cst_51 {dimension_numbers = #tpu.dot_dimension_numbers<[1], [0], [0], [1], [0, 0, 1, 1], [], []>} : vector<8x128xbf16>, vector<128x128xbf16>, vector<8x128xf32> -> vector<8x128xf32>
    %c56 = arith.constant 56 : index
    %c0_52 = arith.constant 0 : index
    %160 = vector.load %arg11[%c56, %c0_52] : memref<64x128xf32, #tpu.memory_space<vmem>>, vector<8x128xf32>
    %161 = arith.addf %160, %159 : vector<8x128xf32>
    %162 = arith.addf %161, %9 : vector<8x128xf32>
    %163 = arith.negf %162 : vector<8x128xf32>
    %164 = math.exp %163 : vector<8x128xf32>
    %cst_53 = arith.constant 1.000000e+00 : f32
    %165 = vector.broadcast %cst_53 : f32 to vector<8x128xf32>
    %166 = arith.addf %165, %164 : vector<8x128xf32>
    %167 = arith.divf %165, %166 : vector<8x128xf32>
    %168 = arith.addf %161, %12 : vector<8x128xf32>
    %169 = math.tanh %168 : vector<8x128xf32>
    %170 = vector.broadcast %13 : f32 to vector<8x128xf32>
    %171 = arith.mulf %170, %167 : vector<8x128xf32>
    %172 = vector.broadcast %15 : f32 to vector<8x128xf32>
    %173 = arith.subf %172, %171 : vector<8x128xf32>
    %174 = arith.mulf %173, %169 : vector<8x128xf32>
    %175 = arith.mulf %167, %156 : vector<8x128xf32>
    %176 = arith.addf %174, %175 : vector<8x128xf32>
    %c0_54 = arith.constant 0 : index
    %c0_55 = arith.constant 0 : index
    %177 = vector.load %arg10[%c0_54, %c0_55] : memref<8x128xf32, #tpu.memory_space<vmem>>, vector<8x128xf32>
    tpu.vector_store %arg10[%c0_54, %c0_55], %176 {strides = array<i32>} : memref<8x128xf32, #tpu.memory_space<vmem>>, vector<8x128xf32>,
    %c0_56 = arith.constant 0 : index
    %c0_57 = arith.constant 0 : index
    %178 = vector.load %arg9[%c0_56, %c0_57] : memref<8x128xf32, #tpu.memory_space<vmem>>, vector<8x128xf32>
    tpu.vector_store %arg9[%c0_56, %c0_57], %176 {strides = array<i32>} : memref<8x128xf32, #tpu.memory_space<vmem>>, vector<8x128xf32>,
    return
  }
  func.func @transform_0(%arg0: i32, %arg1: i32) -> i32 {
    %c0_i32 = arith.constant 0 : i32
    %c0_i32_0 = arith.constant 0 : i32
    return %c0_i32 : i32
  }
  func.func @transform_1(%arg0: i32, %arg1: i32) -> i32 {
    %c0_i32 = arith.constant 0 : i32
    %c0_i32_0 = arith.constant 0 : i32
    return %c0_i32 : i32
  }
  func.func @transform_2(%arg0: i32, %arg1: i32) -> (i32, i32) {
    %c1_i32 = arith.constant 1 : i32
    %0 = arith.muli %arg1, %c1_i32 : i32
    %1 = arith.addi %0, %arg0 : i32
    %c0_i32 = arith.constant 0 : i32
    %c0_i32_0 = arith.constant 0 : i32
    return %1, %c0_i32 : i32, i32
  }
  func.func @transform_3(%arg0: i32, %arg1: i32) -> (i32, i32) {
    %c0_i32 = arith.constant 0 : i32
    %c0_i32_0 = arith.constant 0 : i32
    %c0_i32_1 = arith.constant 0 : i32
    return %c0_i32, %c0_i32_0 : i32, i32
  }
  func.func @transform_4(%arg0: i32, %arg1: i32) -> (i32, i32) {
    %c0_i32 = arith.constant 0 : i32
    %c0_i32_0 = arith.constant 0 : i32
    %c0_i32_1 = arith.constant 0 : i32
    return %c0_i32, %c0_i32_0 : i32, i32
  }
  func.func @transform_5(%arg0: i32, %arg1: i32) -> (i32, i32) {
    %c0_i32 = arith.constant 0 : i32
    %c0_i32_0 = arith.constant 0 : i32
    %c0_i32_1 = arith.constant 0 : i32
    return %c0_i32, %c0_i32_0 : i32, i32
  }
  func.func @transform_6(%arg0: i32, %arg1: i32) -> (i32, i32) {
    %c0_i32 = arith.constant 0 : i32
    %c0_i32_0 = arith.constant 0 : i32
    %c0_i32_1 = arith.constant 0 : i32
    return %c0_i32, %c0_i32_0 : i32, i32
  }
  func.func @transform_7(%arg0: i32, %arg1: i32) -> (i32, i32) {
    %c0_i32 = arith.constant 0 : i32
    %c0_i32_0 = arith.constant 0 : i32
    return %arg0, %c0_i32 : i32, i32
  }
}

</mosaic_0001>

<bundles_post_ra>
// kernel: tpu_custom_call.1
= control target key start
LH: loop header
LB: loop body
LE: loop exit
PB: predicated region body
PF: predicated region fallthrough
CT: control target
= control target key end

     0   :  { %13 = vsyncpa [#allocation8], 0  ;;  %s1489_s0 = inlined_call_operand.vmem [shape: f32[2], index: 0, kind: input, shape index: {}]   ;;  %s1490_s1 = inlined_call_operand.<no memory space> [shape: s32[1], index: 1, kind: input, shape index: {}]   ;;  %s1491_s2 = inlined_call_operand.vmem [shape: bf16[64,4], index: 2, kind: input, shape index: {}]   ;;  %s1492_s3 = inlined_call_operand.vmem [shape: bf16[4,128], index: 3, kind: input, shape index: {}]   ;;  %s1493_s4 = inlined_call_operand.hbm [shape: bf16[128,128], index: 4, kind: input, shape index: {}]   ;;  %s1494_s5 = inlined_call_operand.vmem [shape: f32[1,128], index: 5, kind: input, shape index: {}]   ;;  %s1495_s6 = inlined_call_operand.vmem [shape: f32[1,128], index: 6, kind: input, shape index: {}]   ;;  %s1496_s7 = inlined_call_operand.hbm [shape: f32[8,128], index: 7, kind: output, shape index: {}]  }
   0x1   :  { %14 = vsyncpa [#allocation6], 0 }
   0x2   :  { %15 = vsyncpa [#allocation7], 0  ;;  %s22_s25 = sshll.u32 %s1489_s0, 4  ;;  %s23_s25 = int_to_ptr.vmem [resolvable:$true] %s22_s25 }
   0x3   :  { %s1109_s26 = scalar_lea.vmem %s23_s25, 16  ;;  %p1114_p1 = scmp.lt.s32.totalorder %s23_s25, %s23_s25 }
   0x4   :  { %p1110_p0 = scmp.ne.s32.totalorder %s23_s25, %s1109_s26  ;;  %p1115_p2 = scmp.lt.s32.totalorder %s1109_s26, %s1109_s26 }
   0x6   :  { %p1116_p3 = por %p1115_p2, %p1114_p1 }
   0x8   :  { %p1117_p4 = pnand %p1116_p3, %p1110_p0 }
   0xa   :  { %1120 = shalt.err (!%p1117_p4)
}
   0xb   :  { %s1171_s27 = smov [#allocation5]   ;;  %s1172_s28 = smov [#allocation9]  }
   0xc   :  { %25 = dma.vmem_to_smem %s23_s25, 16, %s1171_s27, [#allocation8]  }
   0xd   :  { %s45_s29 = sshll.u32 %s1172_s28, 4  ;;  %s1121_s9 = scalar_lea.hbm %s1493_s4, 1024  ;;  %s46_s29 = int_to_ptr.vmem [resolvable:$true] %s45_s29 }
   0xe   :  { %p1122_p5 = scmp.ne.s32.totalorder %s1493_s4, %s1121_s9  ;;  %p1125_p6 = scmp.lt.u32.totalorder %s1121_s9, %s1493_s4 }
  0x10   :  { %p1127_p7 = pnand %p1125_p6, %p1122_p5 }
  0x12   :  { %1130 = shalt.err (!%p1127_p7)
}
  0x13   :  { %s1131_s13 = scalar_lea.vmem %s46_s29, 1024  ;;  %p1136_p9 = scmp.lt.s32.totalorder %s46_s29, %s46_s29 }
  0x14   :  { %p1132_p8 = scmp.ne.s32.totalorder %s46_s29, %s1131_s13  ;;  %p1137_p10 = scmp.lt.s32.totalorder %s1131_s13, %s1131_s13 }
  0x16   :  { %p1138_p11 = por %p1137_p10, %p1136_p9 }
  0x18   :  { %p1139_p12 = pnand %p1138_p11, %p1132_p8 }
  0x1a   :  { %1142 = shalt.err (!%p1139_p12)
}
  0x1b   :  { %s1173_s14 = smov 64   ;;  %s1174_s15 = smov 4  }
  0x1c   :  { %51 = dma.hbm_to_vmem [thread:$0]  %s1493_s4, 1024, %s46_s29, [#allocation6], %s1173_s14, %s1173_s14, %s1174_s15  }
  0x1d   :  { %1165 = dma.done.wait [#allocation8], 16  }
  0x1e   :  { %1166 = vsyncadd [#allocation8], 4294967280 }
  0x1f   :  { %1167 = dma.done.wait [#allocation6], 1024  }
  0x20   :  { %1168 = vsyncadd [#allocation6], 4294966272 }
  0x21   :  { %62 = sfence }
  0x22   :  { %v1234_v0 = vld [vmem:[#allocation9] sm:$0xff]   ;;  %v1175_v1 = vmov 0.0   ;;  %v1238_v2 = vld [vmem:[#allocation9 + $0x8] sm:$0xff]   ;;  %vm125_vm0 = vcmask 1041408   ;;  %vm1176_vm1 = vmmov 0   ;;  %v1243_v3 = vld [vmem:[#allocation9 + $0x10] sm:$0xff]  }
  0x23   :  { %880 = vmatprep.subr.bf16.mxu1 %v1175_v1  ;;  %896 = vmatprep.mubr.msk.bf16.mxu1 %vm1176_vm1, %v1175_v1  ;;  %v91_v4 = vld [vmem:[%s1492_s3] sm:$0x3]  ;;  %vm112_vm2 = vcmask 31744   ;;  %v1057_v7 = vld [vmem:[%s1491_s2 + $0x8] sm:$0xff]   ;;  %v1258_v8 = vld [vmem:[#allocation9 + $0x18] sm:$0xff]   ;;  %v1177_v13 = vmov 0.0|0.0  }
  0x24   :  { %881 = vmatpush3.bf16.msra.mxu1 %v1234_v0  ;;  %1040 = vmatprep.subr.msk.bf16.mxu0 %vm125_vm0, %v91_v4  ;;  %v127_v5 = vsel %vm125_vm0, %v91_v4, 0  ;;  %v1056_v6 = vld [vmem:[%s1491_s2] sm:$0xff]   ;;  %v1272_v10 = vld [vmem:[#allocation9 + $0x28] sm:$0xff]   ;;  %v1278_v11 = vld [vmem:[#allocation9 + $0x30] sm:$0xff]   ;;  %s216_s28 = sld [smem:[#allocation5]]  ;;  %s776_s29 = sld [smem:[#allocation5 + $0x1]] }
  0x25   :  { %882 = vmatprep.subr.bf16.mxu1 %v1175_v1  ;;  %871 = vmatpush3.bf16.msra.mxu0 %v127_v5  ;;  %v1266_v9 = vld [vmem:[#allocation9 + $0x20] sm:$0xff]   ;;  %v1284_v12 = vld [vmem:[#allocation9 + $0x38] sm:$0xff]   ;;  %v1059_v14 = vld [vmem:[%s1491_s2 + $0x10] sm:$0xff]  }
  0x26   :  { %900 = vmatprep.subr.bf16.mxu0 %v1175_v1  ;;  %872 = vmatprep.mubr.msk.bf16.mxu0 %vm112_vm2, %v1056_v6  ;;  %v1060_v15 = vld [vmem:[%s1491_s2 + $0x18] sm:$0xff]   ;;  %v1332_v20 = vld [vmem:[%s1494_s5] ss:$0 sm:$0xff] }
  0x27   :  { %v1338_v29 = vld [vmem:[%s1495_s6] ss:$0 sm:$0xff]  ;;  %s1178_s6 = smov [#allocation10]  }
  0x28   :  { %883 = vmatpush3.bf16.msra.mxu1 %v1238_v2  ;;  %873 = vmatmul.mubr.msk.bf16.vlgmr.msra.gmra.mrb[0].mxu0 %vm112_vm2, %v1057_v7  ;;  %s750_s30 = sshll.u32 %s1178_s6, 4  ;;  %s751_s30 = int_to_ptr.vmem [resolvable:$true] %s750_s30 }
  0x29   :  { %884 = vmatprep.subr.bf16.mxu1 %v1175_v1  ;;  %901 = vmatpush3.bf16.msra.mxu0 %v1234_v0  ;;  %s1143_s8 = scalar_lea.vmem %s751_s30, 128  ;;  %p1148_p0 = scmp.lt.s32.totalorder %s751_s30, %s751_s30 }
  0x2a   :  { %902 = vmatprep.subr.bf16.mxu0 %v1175_v1  ;;  %876 = vmatprep.mubr.msk.bf16.mxu0 %vm112_vm2, %v1059_v14  ;;  %s218_s5 = sadd.f32 %s776_s29, %s216_s28  ;;  %v1341_v32 = vstv %s216_s28  ;;  %p1144_p13 = scmp.ne.s32.totalorder %s751_s30, %s1143_s8 }
  0x2b   :  { %p1149_p1 = scmp.lt.s32.totalorder %s1143_s8, %s1143_s8 }
  0x2c   :  { %885 = vmatpush3.bf16.msra.mxu1 %v1243_v3  ;;  %v1343_v34 = vstv %s218_s5 }
  0x2d   :  { %886 = vmatprep.subr.bf16.mxu1 %v1175_v1  ;;  %903 = vmatpush3.bf16.msra.mxu0 %v1238_v2  ;;  %p1150_p2 = por %p1149_p1, %p1148_p0 }
  0x2e   :  { %904 = vmatprep.subr.bf16.mxu0 %v1175_v1 }
  0x2f   :  { %p1151_p3 = pnand %p1150_p2, %p1144_p13 }
  0x30   :  { %887 = vmatpush3.bf16.msra.mxu1 %v1258_v8  ;;  %877 = vmatmul.mubr.msk.bf16.gmra.mrb[4].mxu0 %vm112_vm2, %v1060_v15 }
  0x31   :  { %888 = vmatprep.subr.bf16.mxu1 %v1175_v1  ;;  %905 = vmatpush3.bf16.msra.mxu0 %v1243_v3 }
  0x32   :  { %906 = vmatprep.subr.bf16.mxu0 %v1175_v1  ;;  %916 = vmatprep.mubr.msk.bf16.mxu0 %vm1176_vm1, %v1175_v1 }
  0x34   :  { %889 = vmatpush3.bf16.msra.mxu1 %v1266_v9 }
  0x35   :  { %890 = vmatprep.subr.bf16.mxu1 %v1175_v1  ;;  %907 = vmatpush3.bf16.msra.mxu0 %v1258_v8 }
  0x36   :  { %908 = vmatprep.subr.bf16.mxu0 %v1175_v1 }
  0x38   :  { %891 = vmatpush3.bf16.msra.mxu1 %v1272_v10 }
  0x39   :  { %892 = vmatprep.subr.bf16.mxu1 %v1175_v1  ;;  %909 = vmatpush3.bf16.msra.mxu0 %v1266_v9 }
  0x3a   :  { %910 = vmatprep.subr.bf16.mxu0 %v1175_v1 }
  0x3c   :  { %893 = vmatpush3.bf16.msra.mxu1 %v1278_v11 }
  0x3d   :  { %894 = vmatprep.subr.bf16.mxu1 %v1175_v1  ;;  %911 = vmatpush3.bf16.msra.mxu0 %v1272_v10 }
  0x3e   :  { %912 = vmatprep.subr.bf16.mxu0 %v1175_v1 }
  0x40   :  { %895 = vmatpush3.bf16.msra.mxu1 %v1284_v12 }
  0x41   :  { %920 = vmatprep.subr.bf16.mxu1 %v1175_v1  ;;  %913 = vmatpush3.bf16.msra.mxu0 %v1278_v11 }
  0x42   :  { %914 = vmatprep.subr.bf16.mxu0 %v1175_v1 }
  0x43   :  { %897 = vmatmul.mubr.bf16.vlgmr.msra.gmra.mrb[0].mxu1 %v1177_v13 }
  0x44   :  { %921 = vmatpush3.bf16.msra.mxu1 %v1234_v0  ;;  %936 = vmatprep.mubr.msk.bf16.mxu1 %vm1176_vm1, %v1175_v1 }
  0x45   :  { %922 = vmatprep.subr.bf16.mxu1 %v1175_v1  ;;  %915 = vmatpush3.bf16.msra.mxu0 %v1284_v12 }
  0x46   :  { %940 = vmatprep.subr.bf16.mxu0 %v1175_v1 }
  0x48   :  { %923 = vmatpush3.bf16.msra.mxu1 %v1238_v2 }
  0x49   :  { %924 = vmatprep.subr.bf16.mxu1 %v1175_v1 }
  0x4c   :  { %925 = vmatpush3.bf16.msra.mxu1 %v1243_v3 }
  0x4d   :  { %926 = vmatprep.subr.bf16.mxu1 %v1175_v1 }
  0x50   :  { %927 = vmatpush3.bf16.msra.mxu1 %v1258_v8 }
  0x51   :  { %928 = vmatprep.subr.bf16.mxu1 %v1175_v1 }
  0x54   :  { %929 = vmatpush3.bf16.msra.mxu1 %v1266_v9 }
  0x55   :  { %930 = vmatprep.subr.bf16.mxu1 %v1175_v1 }
  0x58   :  { %931 = vmatpush3.bf16.msra.mxu1 %v1272_v10 }
  0x59   :  { %932 = vmatprep.subr.bf16.mxu1 %v1175_v1 }
  0x5c   :  { %933 = vmatpush3.bf16.msra.mxu1 %v1278_v11 }
  0x5d   :  { %934 = vmatprep.subr.bf16.mxu1 %v1175_v1 }
  0x60   :  { %935 = vmatpush3.bf16.msra.mxu1 %v1284_v12 }
  0x61   :  { %960 = vmatprep.subr.bf16.mxu1 %v1175_v1 }
  0xfb   :  { %v1325_v16 = vpop.f32.mrb[0].mxu0 }
  0xfc   :  { %v163_v17 = vpop.f32.mrb[1].mxu0 }
  0xfd   :  { %v1327_v18 = vpop.f32.mrb[2].mxu0 }
  0xfe   :  { %v166_v19 = vpop.f32.mrb[3].mxu0 }
 0x103   :  { %v1365_v42 = vpop.f32.mrb[4].mxu0 }
 0x104   :  { %v1367_v43 = vpop.f32.mrb[5].mxu0 }
 0x105   :  { %v1369_v44 = vpop.f32.mrb[6].mxu0 }
 0x106   :  { %v1371_v45 = vpop.f32.mrb[7].mxu0 }
 0x116   :  { %v319_v21 = vpop.f32.mrb[0].mxu1 }
 0x117   :  { %v326_v22 = vadd.f32 %v319_v21, %v163_v17  ;;  %v898_v23 = vpop.f32.mrb[1].mxu1 }
 0x118   :  { %v322_v24 = vpop.f32.mrb[2].mxu1 }
 0x119   :  { %v327_v25 = vadd.f32 %v1332_v20, %v326_v22  ;;  %v899_v26 = vpop.f32.mrb[3].mxu1  ;;  %v334_v31 = vadd.f32 %v1338_v29, %v326_v22 }
 0x11b   :  { %v785_v27 = vmul.f32 -1.442695, %v327_v25 }
 0x11d   :  { %1061 = vpow2.f32 %v785_v27 }
 0x127   :  { %v1062_v28 = vpop.eup %1061 }
 0x128   :  { %v331_v30 = vadd.f32 1.0, %v1062_v28 }
 0x12a   :  { %1063 = vrcp.f32 %v331_v30 }
 0x12b   :  { %1065 = vtanh.f32 %v334_v31 }
 0x134   :  { %v1064_v33 = vpop.eup %1063 }
 0x135   :  { %v337_v35 = vmul.f32 %v1064_v33, %v1341_v32  ;;  %v1066_v37 = vpop.eup %1065  ;;  %v341_v39 = vmul.f32 0.0, %v1064_v33 }
 0x137   :  { %v339_v36 = vsub.f32 %v1343_v34, %v337_v35 }
 0x139   :  { %v340_v38 = vmul.f32 %v1066_v37, %v339_v36 }
 0x13b   :  { %v342_v40 = vadd.f32 %v341_v39, %v340_v38 }
 0x13d   :  { %v343_v41 = vpack.c.bf16 %v342_v40, %v342_v40 }
 0x13f   :  { %917 = vmatmul.mubr.bf16.vlgmr.msra.gmra.mrb[8].mxu0 %v343_v41 }
 0x140   :  { %941 = vmatpush3.bf16.msra.mxu0 %v1234_v0  ;;  %956 = vmatprep.mubr.msk.bf16.mxu0 %vm1176_vm1, %v1175_v1 }
 0x141   :  { %942 = vmatprep.subr.bf16.mxu0 %v1175_v1 }
 0x144   :  { %943 = vmatpush3.bf16.msra.mxu0 %v1238_v2 }
 0x145   :  { %944 = vmatprep.subr.bf16.mxu0 %v1175_v1 }
 0x148   :  { %945 = vmatpush3.bf16.msra.mxu0 %v1243_v3 }
 0x149   :  { %946 = vmatprep.subr.bf16.mxu0 %v1175_v1 }
 0x14c   :  { %947 = vmatpush3.bf16.msra.mxu0 %v1258_v8 }
 0x14d   :  { %948 = vmatprep.subr.bf16.mxu0 %v1175_v1 }
 0x150   :  { %949 = vmatpush3.bf16.msra.mxu0 %v1266_v9 }
 0x151   :  { %950 = vmatprep.subr.bf16.mxu0 %v1175_v1 }
 0x154   :  { %951 = vmatpush3.bf16.msra.mxu0 %v1272_v10 }
 0x155   :  { %952 = vmatprep.subr.bf16.mxu0 %v1175_v1 }
 0x158   :  { %953 = vmatpush3.bf16.msra.mxu0 %v1278_v11 }
 0x159   :  { %954 = vmatprep.subr.bf16.mxu0 %v1175_v1 }
 0x15c   :  { %955 = vmatpush3.bf16.msra.mxu0 %v1284_v12 }
 0x15d   :  { %980 = vmatprep.subr.bf16.mxu0 %v1175_v1 }
 0x212   :  { %v378_v46 = vpop.f32.mrb[8].mxu0 }
 0x213   :  { %v385_v47 = vadd.f32 %v378_v46, %v166_v19  ;;  %v918_v48 = vpop.f32.mrb[9].mxu0 }
 0x214   :  { %v381_v49 = vpop.f32.mrb[10].mxu0 }
 0x215   :  { %v386_v50 = vadd.f32 %v1332_v20, %v385_v47  ;;  %v919_v51 = vpop.f32.mrb[11].mxu0  ;;  %v393_v55 = vadd.f32 %v1338_v29, %v385_v47 }
 0x217   :  { %v786_v52 = vmul.f32 -1.442695, %v386_v50 }
 0x219   :  { %1067 = vpow2.f32 %v786_v52 }
 0x223   :  { %v1068_v53 = vpop.eup %1067 }
 0x224   :  { %v390_v54 = vadd.f32 1.0, %v1068_v53 }
 0x226   :  { %1069 = vrcp.f32 %v390_v54 }
 0x227   :  { %1071 = vtanh.f32 %v393_v55 }
 0x230   :  { %v1070_v56 = vpop.eup %1069 }
 0x231   :  { %v395_v57 = vmul.f32 %v1070_v56, %v1341_v32  ;;  %v1072_v59 = vpop.eup %1071  ;;  %v398_v61 = vmul.f32 %v1070_v56, %v342_v40 }
 0x233   :  { %v396_v58 = vsub.f32 %v1343_v34, %v395_v57 }
 0x235   :  { %v397_v60 = vmul.f32 %v1072_v59, %v396_v58 }
 0x237   :  { %v399_v62 = vadd.f32 %v398_v61, %v397_v60 }
 0x239   :  { %v400_v63 = vpack.c.bf16 %v399_v62, %v399_v62 }
 0x23b   :  { %937 = vmatmul.mubr.bf16.vlgmr.msra.gmra.mrb[4].mxu1 %v400_v63 }
 0x23c   :  { %961 = vmatpush3.bf16.msra.mxu1 %v1234_v0  ;;  %976 = vmatprep.mubr.msk.bf16.mxu1 %vm1176_vm1, %v1175_v1 }
 0x23d   :  { %962 = vmatprep.subr.bf16.mxu1 %v1175_v1 }
 0x240   :  { %963 = vmatpush3.bf16.msra.mxu1 %v1238_v2 }
 0x241   :  { %964 = vmatprep.subr.bf16.mxu1 %v1175_v1 }
 0x244   :  { %965 = vmatpush3.bf16.msra.mxu1 %v1243_v3 }
 0x245   :  { %966 = vmatprep.subr.bf16.mxu1 %v1175_v1 }
 0x248   :  { %967 = vmatpush3.bf16.msra.mxu1 %v1258_v8 }
 0x249   :  { %968 = vmatprep.subr.bf16.mxu1 %v1175_v1 }
 0x24c   :  { %969 = vmatpush3.bf16.msra.mxu1 %v1266_v9 }
 0x24d   :  { %970 = vmatprep.subr.bf16.mxu1 %v1175_v1 }
 0x250   :  { %971 = vmatpush3.bf16.msra.mxu1 %v1272_v10 }
 0x251   :  { %972 = vmatprep.subr.bf16.mxu1 %v1175_v1 }
 0x254   :  { %973 = vmatpush3.bf16.msra.mxu1 %v1278_v11 }
 0x255   :  { %974 = vmatprep.subr.bf16.mxu1 %v1175_v1 }
 0x258   :  { %975 = vmatpush3.bf16.msra.mxu1 %v1284_v12 }
 0x259   :  { %1000 = vmatprep.subr.bf16.mxu1 %v1175_v1 }
 0x30e   :  { %v435_v4 = vpop.f32.mrb[4].mxu1 }
 0x30f   :  { %v442_v5 = vadd.f32 %v1325_v16, %v435_v4  ;;  %v938_v6 = vpop.f32.mrb[5].mxu1 }
 0x310   :  { %v438_v7 = vpop.f32.mrb[6].mxu1 }
 0x311   :  { %v443_v13 = vadd.f32 %v1332_v20, %v442_v5  ;;  %v939_v14 = vpop.f32.mrb[7].mxu1  ;;  %v450_v21 = vadd.f32 %v1338_v29, %v442_v5 }
 0x313   :  { %v787_v15 = vmul.f32 -1.442695, %v443_v13 }
 0x315   :  { %1073 = vpow2.f32 %v787_v15 }
 0x31f   :  { %v1074_v17 = vpop.eup %1073 }
 0x320   :  { %v447_v19 = vadd.f32 1.0, %v1074_v17 }
 0x322   :  { %1075 = vrcp.f32 %v447_v19 }
 0x323   :  { %1077 = vtanh.f32 %v450_v21 }
 0x32c   :  { %v1076_v22 = vpop.eup %1075 }
 0x32d   :  { %v452_v23 = vmul.f32 %v1076_v22, %v1341_v32  ;;  %v1078_v25 = vpop.eup %1077  ;;  %v455_v26 = vmul.f32 %v1076_v22, %v399_v62 }
 0x32f   :  { %v453_v24 = vsub.f32 %v1343_v34, %v452_v23 }
 0x331   :  { %v454_v16 = vmul.f32 %v1078_v25, %v453_v24 }
 0x333   :  { %v456_v27 = vadd.f32 %v455_v26, %v454_v16 }
 0x335   :  { %v457_v28 = vpack.c.bf16 %v456_v27, %v456_v27 }
 0x337   :  { %957 = vmatmul.mubr.bf16.vlgmr.msra.gmra.mrb[12].mxu0 %v457_v28 }
 0x338   :  { %981 = vmatpush3.bf16.msra.mxu0 %v1234_v0  ;;  %996 = vmatprep.mubr.msk.bf16.mxu0 %vm1176_vm1, %v1175_v1 }
 0x339   :  { %982 = vmatprep.subr.bf16.mxu0 %v1175_v1 }
 0x33c   :  { %983 = vmatpush3.bf16.msra.mxu0 %v1238_v2 }
 0x33d   :  { %984 = vmatprep.subr.bf16.mxu0 %v1175_v1 }
 0x340   :  { %985 = vmatpush3.bf16.msra.mxu0 %v1243_v3 }
 0x341   :  { %986 = vmatprep.subr.bf16.mxu0 %v1175_v1 }
 0x344   :  { %987 = vmatpush3.bf16.msra.mxu0 %v1258_v8 }
 0x345   :  { %988 = vmatprep.subr.bf16.mxu0 %v1175_v1 }
 0x348   :  { %989 = vmatpush3.bf16.msra.mxu0 %v1266_v9 }
 0x349   :  { %990 = vmatprep.subr.bf16.mxu0 %v1175_v1 }
 0x34c   :  { %991 = vmatpush3.bf16.msra.mxu0 %v1272_v10 }
 0x34d   :  { %992 = vmatprep.subr.bf16.mxu0 %v1175_v1 }
 0x350   :  { %993 = vmatpush3.bf16.msra.mxu0 %v1278_v11 }
 0x351   :  { %994 = vmatprep.subr.bf16.mxu0 %v1175_v1 }
 0x354   :  { %995 = vmatpush3.bf16.msra.mxu0 %v1284_v12 }
 0x355   :  { %1020 = vmatprep.subr.bf16.mxu0 %v1175_v1 }
 0x40a   :  { %v492_v30 = vpop.f32.mrb[12].mxu0 }
 0x40b   :  { %v499_v31 = vadd.f32 %v1327_v18, %v492_v30  ;;  %v958_v33 = vpop.f32.mrb[13].mxu0 }
 0x40c   :  { %v495_v35 = vpop.f32.mrb[14].mxu0 }
 0x40d   :  { %v500_v36 = vadd.f32 %v1332_v20, %v499_v31  ;;  %v959_v37 = vpop.f32.mrb[15].mxu0  ;;  %v507_v41 = vadd.f32 %v1338_v29, %v499_v31 }
 0x40f   :  { %v788_v38 = vmul.f32 -1.442695, %v500_v36 }
 0x411   :  { %1079 = vpow2.f32 %v788_v38 }
 0x41b   :  { %v1080_v39 = vpop.eup %1079 }
 0x41c   :  { %v504_v40 = vadd.f32 1.0, %v1080_v39 }
 0x41e   :  { %1081 = vrcp.f32 %v504_v40 }
 0x41f   :  { %1083 = vtanh.f32 %v507_v41 }
 0x428   :  { %v1082_v46 = vpop.eup %1081 }
 0x429   :  { %v509_v47 = vmul.f32 %v1082_v46, %v1341_v32  ;;  %v1084_v49 = vpop.eup %1083  ;;  %v512_v50 = vmul.f32 %v1082_v46, %v456_v27 }
 0x42b   :  { %v510_v48 = vsub.f32 %v1343_v34, %v509_v47 }
 0x42d   :  { %v511_v18 = vmul.f32 %v1084_v49, %v510_v48 }
 0x42f   :  { %v513_v51 = vadd.f32 %v512_v50, %v511_v18 }
 0x431   :  { %v514_v52 = vpack.c.bf16 %v513_v51, %v513_v51 }
 0x433   :  { %977 = vmatmul.mubr.bf16.vlgmr.msra.gmra.mrb[8].mxu1 %v514_v52 }
 0x434   :  { %1001 = vmatpush3.bf16.msra.mxu1 %v1234_v0  ;;  %1016 = vmatprep.mubr.msk.bf16.mxu1 %vm1176_vm1, %v1175_v1 }
 0x435   :  { %1002 = vmatprep.subr.bf16.mxu1 %v1175_v1 }
 0x438   :  { %1003 = vmatpush3.bf16.msra.mxu1 %v1238_v2 }
 0x439   :  { %1004 = vmatprep.subr.bf16.mxu1 %v1175_v1 }
 0x43c   :  { %1005 = vmatpush3.bf16.msra.mxu1 %v1243_v3 }
 0x43d   :  { %1006 = vmatprep.subr.bf16.mxu1 %v1175_v1 }
 0x440   :  { %1007 = vmatpush3.bf16.msra.mxu1 %v1258_v8 }
 0x441   :  { %1008 = vmatprep.subr.bf16.mxu1 %v1175_v1 }
 0x444   :  { %1009 = vmatpush3.bf16.msra.mxu1 %v1266_v9 }
 0x445   :  { %1010 = vmatprep.subr.bf16.mxu1 %v1175_v1 }
 0x448   :  { %1011 = vmatpush3.bf16.msra.mxu1 %v1272_v10 }
 0x449   :  { %1012 = vmatprep.subr.bf16.mxu1 %v1175_v1 }
 0x44c   :  { %1013 = vmatpush3.bf16.msra.mxu1 %v1278_v11 }
 0x44d   :  { %1014 = vmatprep.subr.bf16.mxu1 %v1175_v1 }
 0x450   :  { %1015 = vmatpush3.bf16.msra.mxu1 %v1284_v12 }
 0x506   :  { %v549_v53 = vpop.f32.mrb[8].mxu1 }
 0x507   :  { %v556_v54 = vadd.f32 %v549_v53, %v1367_v43  ;;  %v978_v55 = vpop.f32.mrb[9].mxu1 }
 0x508   :  { %v552_v56 = vpop.f32.mrb[10].mxu1 }
 0x509   :  { %v557_v57 = vadd.f32 %v1332_v20, %v556_v54  ;;  %v979_v58 = vpop.f32.mrb[11].mxu1  ;;  %v564_v62 = vadd.f32 %v1338_v29, %v556_v54 }
 0x50b   :  { %v789_v59 = vmul.f32 -1.442695, %v557_v57 }
 0x50d   :  { %1085 = vpow2.f32 %v789_v59 }
 0x517   :  { %v1086_v60 = vpop.eup %1085 }
 0x518   :  { %v561_v61 = vadd.f32 1.0, %v1086_v60 }
 0x51a   :  { %1087 = vrcp.f32 %v561_v61 }
 0x51b   :  { %1089 = vtanh.f32 %v564_v62 }
 0x524   :  { %v1088_v63 = vpop.eup %1087 }
 0x525   :  { %v566_v4 = vmul.f32 %v1088_v63, %v1341_v32  ;;  %v1090_v6 = vpop.eup %1089  ;;  %v569_v7 = vmul.f32 %v1088_v63, %v513_v51 }
 0x527   :  { %v567_v5 = vsub.f32 %v1343_v34, %v566_v4 }
 0x529   :  { %v568_v43 = vmul.f32 %v1090_v6, %v567_v5 }
 0x52b   :  { %v570_v13 = vadd.f32 %v569_v7, %v568_v43 }
 0x52d   :  { %v571_v14 = vpack.c.bf16 %v570_v13, %v570_v13 }
 0x52f   :  { %997 = vmatmul.mubr.bf16.vlgmr.msra.gmra.mrb[16].mxu0 %v571_v14 }
 0x530   :  { %1021 = vmatpush3.bf16.msra.mxu0 %v1234_v0  ;;  %1036 = vmatprep.mubr.msk.bf16.mxu0 %vm1176_vm1, %v1175_v1 }
 0x531   :  { %1022 = vmatprep.subr.bf16.mxu0 %v1175_v1 }
 0x534   :  { %1023 = vmatpush3.bf16.msra.mxu0 %v1238_v2 }
 0x535   :  { %1024 = vmatprep.subr.bf16.mxu0 %v1175_v1 }
 0x538   :  { %1025 = vmatpush3.bf16.msra.mxu0 %v1243_v3 }
 0x539   :  { %1026 = vmatprep.subr.bf16.mxu0 %v1175_v1 }
 0x53c   :  { %1027 = vmatpush3.bf16.msra.mxu0 %v1258_v8 }
 0x53d   :  { %1028 = vmatprep.subr.bf16.mxu0 %v1175_v1 }
 0x540   :  { %1029 = vmatpush3.bf16.msra.mxu0 %v1266_v9 }
 0x541   :  { %1030 = vmatprep.subr.bf16.mxu0 %v1175_v1 }
 0x544   :  { %1031 = vmatpush3.bf16.msra.mxu0 %v1272_v10 }
 0x545   :  { %1032 = vmatprep.subr.bf16.mxu0 %v1175_v1 }
 0x548   :  { %1033 = vmatpush3.bf16.msra.mxu0 %v1278_v11 }
 0x549   :  { %1034 = vmatprep.subr.bf16.mxu0 %v1175_v1 }
 0x54c   :  { %1035 = vmatpush3.bf16.msra.mxu0 %v1284_v12 }
 0x602   :  { %v606_v0 = vpop.f32.mrb[16].mxu0 }
 0x603   :  { %v613_v2 = vadd.f32 %v606_v0, %v1371_v45  ;;  %v998_v3 = vpop.f32.mrb[17].mxu0 }
 0x604   :  { %v609_v8 = vpop.f32.mrb[18].mxu0 }
 0x605   :  { %v614_v15 = vadd.f32 %v1332_v20, %v613_v2  ;;  %v999_v9 = vpop.f32.mrb[19].mxu0  ;;  %v621_v21 = vadd.f32 %v1338_v29, %v613_v2 }
 0x607   :  { %v790_v17 = vmul.f32 -1.442695, %v614_v15 }
 0x609   :  { %1091 = vpow2.f32 %v790_v17 }
 0x613   :  { %v1092_v19 = vpop.eup %1091 }
 0x614   :  { %v618_v10 = vadd.f32 1.0, %v1092_v19 }
 0x616   :  { %1093 = vrcp.f32 %v618_v10 }
 0x617   :  { %1095 = vtanh.f32 %v621_v21 }
 0x620   :  { %v1094_v11 = vpop.eup %1093 }
 0x621   :  { %v623_v1 = vmul.f32 %v1094_v11, %v1341_v32  ;;  %v1096_v22 = vpop.eup %1095  ;;  %v626_v23 = vmul.f32 %v1094_v11, %v570_v13 }
 0x623   :  { %v624_v12 = vsub.f32 %v1343_v34, %v623_v1 }
 0x625   :  { %v625_v45 = vmul.f32 %v1096_v22, %v624_v12 }
 0x627   :  { %v627_v24 = vadd.f32 %v626_v23, %v625_v45 }
 0x629   :  { %v628_v25 = vpack.c.bf16 %v627_v24, %v627_v24 }
 0x62b   :  { %1017 = vmatmul.mubr.bf16.vlgmr.msra.gmra.mrb[12].mxu1 %v628_v25 }
 0x6fe   :  { %v663_v16 = vpop.f32.mrb[12].mxu1 }
 0x6ff   :  { %v670_v26 = vadd.f32 %v1365_v42, %v663_v16  ;;  %v1018_v27 = vpop.f32.mrb[13].mxu1 }
 0x700   :  { %v666_v28 = vpop.f32.mrb[14].mxu1 }
 0x701   :  { %v671_v30 = vadd.f32 %v1332_v20, %v670_v26  ;;  %v1019_v31 = vpop.f32.mrb[15].mxu1  ;;  %v678_v37 = vadd.f32 %v1338_v29, %v670_v26 }
 0x703   :  { %v791_v33 = vmul.f32 -1.442695, %v671_v30 }
 0x705   :  { %1097 = vpow2.f32 %v791_v33 }
 0x70f   :  { %v1098_v35 = vpop.eup %1097 }
 0x710   :  { %v675_v36 = vadd.f32 1.0, %v1098_v35 }
 0x712   :  { %1099 = vrcp.f32 %v675_v36 }
 0x713   :  { %1101 = vtanh.f32 %v678_v37 }
 0x71c   :  { %v1100_v38 = vpop.eup %1099 }
 0x71d   :  { %v680_v39 = vmul.f32 %v1100_v38, %v1341_v32  ;;  %v1102_v41 = vpop.eup %1101  ;;  %v683_v46 = vmul.f32 %v1100_v38, %v627_v24 }
 0x71f   :  { %v681_v40 = vsub.f32 %v1343_v34, %v680_v39 }
 0x721   :  { %v682_v42 = vmul.f32 %v1102_v41, %v681_v40 }
 0x723   :  { %v684_v47 = vadd.f32 %v683_v46, %v682_v42 }
 0x725   :  { %v685_v48 = vpack.c.bf16 %v684_v47, %v684_v47 }
 0x727   :  { %1037 = vmatmul.mubr.bf16.vlgmr.msra.gmra.mrb[20].mxu0 %v685_v48 }
 0x7fa   :  { %v720_v49 = vpop.f32.mrb[20].mxu0 }
 0x7fb   :  { %v727_v18 = vadd.f32 %v1369_v44, %v720_v49  ;;  %v1038_v50 = vpop.f32.mrb[21].mxu0 }
 0x7fc   :  { %v723_v51 = vpop.f32.mrb[22].mxu0 }
 0x7fd   :  { %v728_v52 = vadd.f32 %v1332_v20, %v727_v18  ;;  %v1039_v53 = vpop.f32.mrb[23].mxu0  ;;  %v735_v57 = vadd.f32 %v1338_v29, %v727_v18 }
 0x7ff   :  { %v792_v54 = vmul.f32 -1.442695, %v728_v52 }
 0x801   :  { %1103 = vpow2.f32 %v792_v54 }
 0x80b   :  { %v1104_v55 = vpop.eup %1103 }
 0x80c   :  { %v732_v56 = vadd.f32 1.0, %v1104_v55 }
 0x80e   :  { %1105 = vrcp.f32 %v732_v56 }
 0x80f   :  { %1107 = vtanh.f32 %v735_v57 }
 0x818   :  { %v1106_v58 = vpop.eup %1105 }
 0x819   :  { %v737_v59 = vmul.f32 %v1106_v58, %v1341_v32  ;;  %v1108_v61 = vpop.eup %1107  ;;  %v740_v62 = vmul.f32 %v1106_v58, %v684_v47 }
 0x81b   :  { %v738_v60 = vsub.f32 %v1343_v34, %v737_v59 }
 0x81d   :  { %v739_v44 = vmul.f32 %v1108_v61, %v738_v60 }
 0x81f   :  { %v741_v20 = vadd.f32 %v740_v62, %v739_v44 }
 0x821   :  { %743 = vst [vmem:[#allocation10] sm:$0xff] %v741_v20 }
 0x822   :  { %1154 = shalt.err (!%p1151_p3)
}
 0x823   :  { %s1155_s11 = scalar_lea.hbm %s1496_s7, 128 }
 0x824   :  { %p1156_p4 = scmp.ne.s32.totalorder %s1496_s7, %s1155_s11  ;;  %p1159_p5 = scmp.lt.u32.totalorder %s1155_s11, %s1496_s7 }
 0x826   :  { %p1161_p6 = pnand %p1159_p5, %p1156_p4 }
 0x828   :  { %1164 = shalt.err (!%p1161_p6)
}
 0x829   :  { %753 = dma.vmem_to_hbm [thread:$0]  %s751_s30, 128, %s1496_s7, [#allocation7]  }
 0x82a   :  { %1169 = dma.done.wait [#allocation7], 128  }
 0x82b   :  { %1170 = vsyncadd [#allocation7], 4294967168 }
 0x82c   :  { %757 = vsyncpa [#allocation6], 1 }
 0x82d   :  { %758 = vsyncpa [#allocation7], 1 }
 0x82e   :  { %759 = vsyncpa [#allocation8], 1 }

// kernel: tpu_custom_call.1
= control target key start
LH: loop header
LB: loop body
LE: loop exit
PB: predicated region body
PF: predicated region fallthrough
CT: control target
= control target key end

     0   :  { %13 = vsyncpa [#allocation8], 0  ;;  %s1489_s0 = inlined_call_operand.vmem [shape: f32[2], index: 0, kind: input, shape index: {}]   ;;  %s1490_s1 = inlined_call_operand.<no memory space> [shape: s32[1], index: 1, kind: input, shape index: {}]   ;;  %s1491_s2 = inlined_call_operand.vmem [shape: bf16[64,4], index: 2, kind: input, shape index: {}]   ;;  %s1492_s3 = inlined_call_operand.vmem [shape: bf16[4,128], index: 3, kind: input, shape index: {}]   ;;  %s1493_s4 = inlined_call_operand.hbm [shape: bf16[128,128], index: 4, kind: input, shape index: {}]   ;;  %s1494_s5 = inlined_call_operand.vmem [shape: f32[1,128], index: 5, kind: input, shape index: {}]   ;;  %s1495_s6 = inlined_call_operand.vmem [shape: f32[1,128], index: 6, kind: input, shape index: {}]   ;;  %s1496_s7 = inlined_call_operand.hbm [shape: f32[8,128], index: 7, kind: output, shape index: {}]  }
   0x1   :  { %14 = vsyncpa [#allocation6], 0 }
   0x2   :  { %15 = vsyncpa [#allocation7], 0  ;;  %s22_s25 = sshll.u32 %s1489_s0, 4  ;;  %s23_s25 = int_to_ptr.vmem [resolvable:$true] %s22_s25 }
   0x3   :  { %s1109_s26 = scalar_lea.vmem %s23_s25, 16  ;;  %p1114_p1 = scmp.lt.s32.totalorder %s23_s25, %s23_s25 }
   0x4   :  { %p1110_p0 = scmp.ne.s32.totalorder %s23_s25, %s1109_s26  ;;  %p1115_p2 = scmp.lt.s32.totalorder %s1109_s26, %s1109_s26 }
   0x6   :  { %p1116_p3 = por %p1115_p2, %p1114_p1 }
   0x8   :  { %p1117_p4 = pnand %p1116_p3, %p1110_p0 }
   0xa   :  { %1120 = shalt.err (!%p1117_p4)
}
   0xb   :  { %s1171_s27 = smov [#allocation5]   ;;  %s1172_s28 = smov [#allocation9]  }
   0xc   :  { %25 = dma.vmem_to_smem %s23_s25, 16, %s1171_s27, [#allocation8]  }
   0xd   :  { %s45_s29 = sshll.u32 %s1172_s28, 4  ;;  %s1121_s9 = scalar_lea.hbm %s1493_s4, 1024  ;;  %s46_s29 = int_to_ptr.vmem [resolvable:$true] %s45_s29 }
   0xe   :  { %p1122_p5 = scmp.ne.s32.totalorder %s1493_s4, %s1121_s9  ;;  %p1125_p6 = scmp.lt.u32.totalorder %s1121_s9, %s1493_s4 }
  0x10   :  { %p1127_p7 = pnand %p1125_p6, %p1122_p5 }
  0x12   :  { %1130 = shalt.err (!%p1127_p7)
}
  0x13   :  { %s1131_s13 = scalar_lea.vmem %s46_s29, 1024  ;;  %p1136_p9 = scmp.lt.s32.totalorder %s46_s29, %s46_s29 }
  0x14   :  { %p1132_p8 = scmp.ne.s32.totalorder %s46_s29, %s1131_s13  ;;  %p1137_p10 = scmp.lt.s32.totalorder %s1131_s13, %s1131_s13 }
  0x16   :  { %p1138_p11 = por %p1137_p10, %p1136_p9 }
  0x18   :  { %p1139_p12 = pnand %p1138_p11, %p1132_p8 }
  0x1a   :  { %1142 = shalt.err (!%p1139_p12)
}
  0x1b   :  { %s1173_s14 = smov 64   ;;  %s1174_s15 = smov 4  }
  0x1c   :  { %51 = dma.hbm_to_vmem [thread:$0]  %s1493_s4, 1024, %s46_s29, [#allocation6], %s1173_s14, %s1173_s14, %s1174_s15  }
  0x1d   :  { %1165 = dma.done.wait [#allocation8], 16  }
  0x1e   :  { %1166 = vsyncadd [#allocation8], 4294967280 }
  0x1f   :  { %1167 = dma.done.wait [#allocation6], 1024  }
  0x20   :  { %1168 = vsyncadd [#allocation6], 4294966272 }
  0x21   :  { %62 = sfence }
  0x22   :  { %v1234_v0 = vld [vmem:[#allocation9] sm:$0xff]   ;;  %v1175_v1 = vmov 0.0   ;;  %v1238_v2 = vld [vmem:[#allocation9 + $0x8] sm:$0xff]   ;;  %vm125_vm0 = vcmask 1041408   ;;  %vm1176_vm1 = vmmov 0   ;;  %v1243_v3 = vld [vmem:[#allocation9 + $0x10] sm:$0xff]  }
  0x23   :  { %880 = vmatprep.subr.bf16.mxu1 %v1175_v1  ;;  %896 = vmatprep.mubr.msk.bf16.mxu1 %vm1176_vm1, %v1175_v1  ;;  %v91_v4 = vld [vmem:[%s1492_s3] sm:$0x3]  ;;  %vm112_vm2 = vcmask 31744   ;;  %v1057_v7 = vld [vmem:[%s1491_s2 + $0x8] sm:$0xff]   ;;  %v1258_v8 = vld [vmem:[#allocation9 + $0x18] sm:$0xff]   ;;  %v1177_v13 = vmov 0.0|0.0  }
  0x24   :  { %881 = vmatpush3.bf16.msra.mxu1 %v1234_v0  ;;  %1040 = vmatprep.subr.msk.bf16.mxu0 %vm125_vm0, %v91_v4  ;;  %v127_v5 = vsel %vm125_vm0, %v91_v4, 0  ;;  %v1056_v6 = vld [vmem:[%s1491_s2] sm:$0xff]   ;;  %v1272_v10 = vld [vmem:[#allocation9 + $0x28] sm:$0xff]   ;;  %v1278_v11 = vld [vmem:[#allocation9 + $0x30] sm:$0xff]   ;;  %s216_s28 = sld [smem:[#allocation5]]  ;;  %s776_s29 = sld [smem:[#allocation5 + $0x1]] }
  0x25   :  { %882 = vmatprep.subr.bf16.mxu1 %v1175_v1  ;;  %871 = vmatpush3.bf16.msra.mxu0 %v127_v5  ;;  %v1266_v9 = vld [vmem:[#allocation9 + $0x20] sm:$0xff]   ;;  %v1284_v12 = vld [vmem:[#allocation9 + $0x38] sm:$0xff]   ;;  %v1059_v14 = vld [vmem:[%s1491_s2 + $0x10] sm:$0xff]  }
  0x26   :  { %900 = vmatprep.subr.bf16.mxu0 %v1175_v1  ;;  %872 = vmatprep.mubr.msk.bf16.mxu0 %vm112_vm2, %v1056_v6  ;;  %v1060_v15 = vld [vmem:[%s1491_s2 + $0x18] sm:$0xff]   ;;  %v1332_v20 = vld [vmem:[%s1494_s5] ss:$0 sm:$0xff] }
  0x27   :  { %v1338_v29 = vld [vmem:[%s1495_s6] ss:$0 sm:$0xff]  ;;  %s1178_s6 = smov [#allocation10]  }
  0x28   :  { %883 = vmatpush3.bf16.msra.mxu1 %v1238_v2  ;;  %873 = vmatmul.mubr.msk.bf16.vlgmr.msra.gmra.mrb[0].mxu0 %vm112_vm2, %v1057_v7  ;;  %s750_s30 = sshll.u32 %s1178_s6, 4  ;;  %s751_s30 = int_to_ptr.vmem [resolvable:$true] %s750_s30 }
  0x29   :  { %884 = vmatprep.subr.bf16.mxu1 %v1175_v1  ;;  %901 = vmatpush3.bf16.msra.mxu0 %v1234_v0  ;;  %s1143_s8 = scalar_lea.vmem %s751_s30, 128  ;;  %p1148_p0 = scmp.lt.s32.totalorder %s751_s30, %s751_s30 }
  0x2a   :  { %902 = vmatprep.subr.bf16.mxu0 %v1175_v1  ;;  %876 = vmatprep.mubr.msk.bf16.mxu0 %vm112_vm2, %v1059_v14  ;;  %s218_s5 = sadd.f32 %s776_s29, %s216_s28  ;;  %v1341_v32 = vstv %s216_s28  ;;  %p1144_p13 = scmp.ne.s32.totalorder %s751_s30, %s1143_s8 }
  0x2b   :  { %p1149_p1 = scmp.lt.s32.totalorder %s1143_s8, %s1143_s8 }
  0x2c   :  { %885 = vmatpush3.bf16.msra.mxu1 %v1243_v3  ;;  %v1343_v34 = vstv %s218_s5 }
  0x2d   :  { %886 = vmatprep.subr.bf16.mxu1 %v1175_v1  ;;  %903 = vmatpush3.bf16.msra.mxu0 %v1238_v2  ;;  %p1150_p2 = por %p1149_p1, %p1148_p0 }
  0x2e   :  { %904 = vmatprep.subr.bf16.mxu0 %v1175_v1 }
  0x2f   :  { %p1151_p3 = pnand %p1150_p2, %p1144_p13 }
  0x30   :  { %887 = vmatpush3.bf16.msra.mxu1 %v1258_v8  ;;  %877 = vmatmul.mubr.msk.bf16.gmra.mrb[4].mxu0 %vm112_vm2, %v1060_v15 }
  0x31   :  { %888 = vmatprep.subr.bf16.mxu1 %v1175_v1  ;;  %905 = vmatpush3.bf16.msra.mxu0 %v1243_v3 }
  0x32   :  { %906 = vmatprep.subr.bf16.mxu0 %v1175_v1  ;;  %916 = vmatprep.mubr.msk.bf16.mxu0 %vm1176_vm1, %v1175_v1 }
  0x34   :  { %889 = vmatpush3.bf16.msra.mxu1 %v1266_v9 }
  0x35   :  { %890 = vmatprep.subr.bf16.mxu1 %v1175_v1  ;;  %907 = vmatpush3.bf16.msra.mxu0 %v1258_v8 }
  0x36   :  { %908 = vmatprep.subr.bf16.mxu0 %v1175_v1 }
  0x38   :  { %891 = vmatpush3.bf16.msra.mxu1 %v1272_v10 }
  0x39   :  { %892 = vmatprep.subr.bf16.mxu1 %v1175_v1  ;;  %909 = vmatpush3.bf16.msra.mxu0 %v1266_v9 }
  0x3a   :  { %910 = vmatprep.subr.bf16.mxu0 %v1175_v1 }
  0x3c   :  { %893 = vmatpush3.bf16.msra.mxu1 %v1278_v11 }
  0x3d   :  { %894 = vmatprep.subr.bf16.mxu1 %v1175_v1  ;;  %911 = vmatpush3.bf16.msra.mxu0 %v1272_v10 }
  0x3e   :  { %912 = vmatprep.subr.bf16.mxu0 %v1175_v1 }
  0x40   :  { %895 = vmatpush3.bf16.msra.mxu1 %v1284_v12 }
  0x41   :  { %920 = vmatprep.subr.bf16.mxu1 %v1175_v1  ;;  %913 = vmatpush3.bf16.msra.mxu0 %v1278_v11 }
  0x42   :  { %914 = vmatprep.subr.bf16.mxu0 %v1175_v1 }
  0x43   :  { %897 = vmatmul.mubr.bf16.vlgmr.msra.gmra.mrb[0].mxu1 %v1177_v13 }
  0x44   :  { %921 = vmatpush3.bf16.msra.mxu1 %v1234_v0  ;;  %936 = vmatprep.mubr.msk.bf16.mxu1 %vm1176_vm1, %v1175_v1 }
  0x45   :  { %922 = vmatprep.subr.bf16.mxu1 %v1175_v1  ;;  %915 = vmatpush3.bf16.msra.mxu0 %v1284_v12 }
  0x46   :  { %940 = vmatprep.subr.bf16.mxu0 %v1175_v1 }
  0x48   :  { %923 = vmatpush3.bf16.msra.mxu1 %v1238_v2 }
  0x49   :  { %924 = vmatprep.subr.bf16.mxu1 %v1175_v1 }
  0x4c   :  { %925 = vmatpush3.bf16.msra.mxu1 %v1243_v3 }
  0x4d   :  { %926 = vmatprep.subr.bf16.mxu1 %v1175_v1 }
  0x50   :  { %927 = vmatpush3.bf16.msra.mxu1 %v1258_v8 }
  0x51   :  { %928 = vmatprep.subr.bf16.mxu1 %v1175_v1 }
  0x54   :  { %929 = vmatpush3.bf16.msra.mxu1 %v1266_v9 }
  0x55   :  { %930 = vmatprep.subr.bf16.mxu1 %v1175_v1 }
  0x58   :  { %931 = vmatpush3.bf16.msra.mxu1 %v1272_v10 }
  0x59   :  { %932 = vmatprep.subr.bf16.mxu1 %v1175_v1 }
  0x5c   :  { %933 = vmatpush3.bf16.msra.mxu1 %v1278_v11 }
  0x5d   :  { %934 = vmatprep.subr.bf16.mxu1 %v1175_v1 }
  0x60   :  { %935 = vmatpush3.bf16.msra.mxu1 %v1284_v12 }
  0x61   :  { %960 = vmatprep.subr.bf16.mxu1 %v1175_v1 }
  0xfb   :  { %v1325_v16 = vpop.f32.mrb[0].mxu0 }
  0xfc   :  { %v163_v17 = vpop.f32.mrb[1].mxu0 }
  0xfd   :  { %v1327_v18 = vpop.f32.mrb[2].mxu0 }
  0xfe   :  { %v166_v19 = vpop.f32.mrb[3].mxu0 }
 0x103   :  { %v1365_v42 = vpop.f32.mrb[4].mxu0 }
 0x104   :  { %v1367_v43 = vpop.f32.mrb[5].mxu0 }
 0x105   :  { %v1369_v44 = vpop.f32.mrb[6].mxu0 }
 0x106   :  { %v1371_v45 = vpop.f32.mrb[7].mxu0 }
 0x116   :  { %v319_v21 = vpop.f32.mrb[0].mxu1 }
 0x117   :  { %v326_v22 = vadd.f32 %v319_v21, %v163_v17  ;;  %v898_v23 = vpop.f32.mrb[1].mxu1 }
 0x118   :  { %v322_v24 = vpop.f32.mrb[2].mxu1 }
 0x119   :  { %v327_v25 = vadd.f32 %v1332_v20, %v326_v22  ;;  %v899_v26 = vpop.f32.mrb[3].mxu1  ;;  %v334_v31 = vadd.f32 %v1338_v29, %v326_v22 }
 0x11b   :  { %v785_v27 = vmul.f32 -1.442695, %v327_v25 }
 0x11d   :  { %1061 = vpow2.f32 %v785_v27 }
 0x127   :  { %v1062_v28 = vpop.eup %1061 }
 0x128   :  { %v331_v30 = vadd.f32 1.0, %v1062_v28 }
 0x12a   :  { %1063 = vrcp.f32 %v331_v30 }
 0x12b   :  { %1065 = vtanh.f32 %v334_v31 }
 0x134   :  { %v1064_v33 = vpop.eup %1063 }
 0x135   :  { %v337_v35 = vmul.f32 %v1064_v33, %v1341_v32  ;;  %v1066_v37 = vpop.eup %1065  ;;  %v341_v39 = vmul.f32 0.0, %v1064_v33 }
 0x137   :  { %v339_v36 = vsub.f32 %v1343_v34, %v337_v35 }
 0x139   :  { %v340_v38 = vmul.f32 %v1066_v37, %v339_v36 }
 0x13b   :  { %v342_v40 = vadd.f32 %v341_v39, %v340_v38 }
 0x13d   :  { %v343_v41 = vpack.c.bf16 %v342_v40, %v342_v40 }
 0x13f   :  { %917 = vmatmul.mubr.bf16.vlgmr.msra.gmra.mrb[8].mxu0 %v343_v41 }
 0x140   :  { %941 = vmatpush3.bf16.msra.mxu0 %v1234_v0  ;;  %956 = vmatprep.mubr.msk.bf16.mxu0 %vm1176_vm1, %v1175_v1 }
 0x141   :  { %942 = vmatprep.subr.bf16.mxu0 %v1175_v1 }
 0x144   :  { %943 = vmatpush3.bf16.msra.mxu0 %v1238_v2 }
 0x145   :  { %944 = vmatprep.subr.bf16.mxu0 %v1175_v1 }
 0x148   :  { %945 = vmatpush3.bf16.msra.mxu0 %v1243_v3 }
 0x149   :  { %946 = vmatprep.subr.bf16.mxu0 %v1175_v1 }
 0x14c   :  { %947 = vmatpush3.bf16.msra.mxu0 %v1258_v8 }
 0x14d   :  { %948 = vmatprep.subr.bf16.mxu0 %v1175_v1 }
 0x150   :  { %949 = vmatpush3.bf16.msra.mxu0 %v1266_v9 }
 0x151   :  { %950 = vmatprep.subr.bf16.mxu0 %v1175_v1 }
 0x154   :  { %951 = vmatpush3.bf16.msra.mxu0 %v1272_v10 }
 0x155   :  { %952 = vmatprep.subr.bf16.mxu0 %v1175_v1 }
 0x158   :  { %953 = vmatpush3.bf16.msra.mxu0 %v1278_v11 }
 0x159   :  { %954 = vmatprep.subr.bf16.mxu0 %v1175_v1 }
 0x15c   :  { %955 = vmatpush3.bf16.msra.mxu0 %v1284_v12 }
 0x15d   :  { %980 = vmatprep.subr.bf16.mxu0 %v1175_v1 }
 0x212   :  { %v378_v46 = vpop.f32.mrb[8].mxu0 }
 0x213   :  { %v385_v47 = vadd.f32 %v378_v46, %v166_v19  ;;  %v918_v48 = vpop.f32.mrb[9].mxu0 }
 0x214   :  { %v381_v49 = vpop.f32.mrb[10].mxu0 }
 0x215   :  { %v386_v50 = vadd.f32 %v1332_v20, %v385_v47  ;;  %v919_v51 = vpop.f32.mrb[11].mxu0  ;;  %v393_v55 = vadd.f32 %v1338_v29, %v385_v47 }
 0x217   :  { %v786_v52 = vmul.f32 -1.442695, %v386_v50 }
 0x219   :  { %1067 = vpow2.f32 %v786_v52 }
 0x223   :  { %v1068_v53 = vpop.eup %1067 }
 0x224   :  { %v390_v54 = vadd.f32 1.0, %v1068_v53 }
 0x226   :  { %1069 = vrcp.f32 %v390_v54 }
 0x227   :  { %1071 = vtanh.f32 %v393_v55 }
 0x230   :  { %v1070_v56 = vpop.eup %1069 }
 0x231   :  { %v395_v57 = vmul.f32 %v1070_v56, %v1341_v32  ;;  %v1072_v59 = vpop.eup %1071  ;;  %v398_v61 = vmul.f32 %v1070_v56, %v342_v40 }
 0x233   :  { %v396_v58 = vsub.f32 %v1343_v34, %v395_v57 }
 0x235   :  { %v397_v60 = vmul.f32 %v1072_v59, %v396_v58 }
 0x237   :  { %v399_v62 = vadd.f32 %v398_v61, %v397_v60 }
 0x239   :  { %v400_v63 = vpack.c.bf16 %v399_v62, %v399_v62 }
 0x23b   :  { %937 = vmatmul.mubr.bf16.vlgmr.msra.gmra.mrb[4].mxu1 %v400_v63 }
 0x23c   :  { %961 = vmatpush3.bf16.msra.mxu1 %v1234_v0  ;;  %976 = vmatprep.mubr.msk.bf16.mxu1 %vm1176_vm1, %v1175_v1 }
 0x23d   :  { %962 = vmatprep.subr.bf16.mxu1 %v1175_v1 }
 0x240   :  { %963 = vmatpush3.bf16.msra.mxu1 %v1238_v2 }
 0x241   :  { %964 = vmatprep.subr.bf16.mxu1 %v1175_v1 }
 0x244   :  { %965 = vmatpush3.bf16.msra.mxu1 %v1243_v3 }
 0x245   :  { %966 = vmatprep.subr.bf16.mxu1 %v1175_v1 }
 0x248   :  { %967 = vmatpush3.bf16.msra.mxu1 %v1258_v8 }
 0x249   :  { %968 = vmatprep.subr.bf16.mxu1 %v1175_v1 }
 0x24c   :  { %969 = vmatpush3.bf16.msra.mxu1 %v1266_v9 }
 0x24d   :  { %970 = vmatprep.subr.bf16.mxu1 %v1175_v1 }
 0x250   :  { %971 = vmatpush3.bf16.msra.mxu1 %v1272_v10 }
 0x251   :  { %972 = vmatprep.subr.bf16.mxu1 %v1175_v1 }
 0x254   :  { %973 = vmatpush3.bf16.msra.mxu1 %v1278_v11 }
 0x255   :  { %974 = vmatprep.subr.bf16.mxu1 %v1175_v1 }
 0x258   :  { %975 = vmatpush3.bf16.msra.mxu1 %v1284_v12 }
 0x259   :  { %1000 = vmatprep.subr.bf16.mxu1 %v1175_v1 }
 0x30e   :  { %v435_v4 = vpop.f32.mrb[4].mxu1 }
 0x30f   :  { %v442_v5 = vadd.f32 %v1325_v16, %v435_v4  ;;  %v938_v6 = vpop.f32.mrb[5].mxu1 }
 0x310   :  { %v438_v7 = vpop.f32.mrb[6].mxu1 }
 0x311   :  { %v443_v13 = vadd.f32 %v1332_v20, %v442_v5  ;;  %v939_v14 = vpop.f32.mrb[7].mxu1  ;;  %v450_v21 = vadd.f32 %v1338_v29, %v442_v5 }
 0x313   :  { %v787_v15 = vmul.f32 -1.442695, %v443_v13 }
 0x315   :  { %1073 = vpow2.f32 %v787_v15 }
 0x31f   :  { %v1074_v17 = vpop.eup %1073 }
 0x320   :  { %v447_v19 = vadd.f32 1.0, %v1074_v17 }
 0x322   :  { %1075 = vrcp.f32 %v447_v19 }
 0x323   :  { %1077 = vtanh.f32 %v450_v21 }
 0x32c   :  { %v1076_v22 = vpop.eup %1075 }
 0x32d   :  { %v452_v23 = vmul.f32 %v1076_v22, %v1341_v32  ;;  %v1078_v25 = vpop.eup %1077  ;;  %v455_v26 = vmul.f32 %v1076_v22, %v399_v62 }
 0x32f   :  { %v453_v24 = vsub.f32 %v1343_v34, %v452_v23 }
 0x331   :  { %v454_v16 = vmul.f32 %v1078_v25, %v453_v24 }
 0x333   :  { %v456_v27 = vadd.f32 %v455_v26, %v454_v16 }
 0x335   :  { %v457_v28 = vpack.c.bf16 %v456_v27, %v456_v27 }
 0x337   :  { %957 = vmatmul.mubr.bf16.vlgmr.msra.gmra.mrb[12].mxu0 %v457_v28 }
 0x338   :  { %981 = vmatpush3.bf16.msra.mxu0 %v1234_v0  ;;  %996 = vmatprep.mubr.msk.bf16.mxu0 %vm1176_vm1, %v1175_v1 }
 0x339   :  { %982 = vmatprep.subr.bf16.mxu0 %v1175_v1 }
 0x33c   :  { %983 = vmatpush3.bf16.msra.mxu0 %v1238_v2 }
 0x33d   :  { %984 = vmatprep.subr.bf16.mxu0 %v1175_v1 }
 0x340   :  { %985 = vmatpush3.bf16.msra.mxu0 %v1243_v3 }
 0x341   :  { %986 = vmatprep.subr.bf16.mxu0 %v1175_v1 }
 0x344   :  { %987 = vmatpush3.bf16.msra.mxu0 %v1258_v8 }
 0x345   :  { %988 = vmatprep.subr.bf16.mxu0 %v1175_v1 }
 0x348   :  { %989 = vmatpush3.bf16.msra.mxu0 %v1266_v9 }
 0x349   :  { %990 = vmatprep.subr.bf16.mxu0 %v1175_v1 }
 0x34c   :  { %991 = vmatpush3.bf16.msra.mxu0 %v1272_v10 }
 0x34d   :  { %992 = vmatprep.subr.bf16.mxu0 %v1175_v1 }
 0x350   :  { %993 = vmatpush3.bf16.msra.mxu0 %v1278_v11 }
 0x351   :  { %994 = vmatprep.subr.bf16.mxu0 %v1175_v1 }
 0x354   :  { %995 = vmatpush3.bf16.msra.mxu0 %v1284_v12 }
 0x355   :  { %1020 = vmatprep.subr.bf16.mxu0 %v1175_v1 }
 0x40a   :  { %v492_v30 = vpop.f32.mrb[12].mxu0 }
 0x40b   :  { %v499_v31 = vadd.f32 %v1327_v18, %v492_v30  ;;  %v958_v33 = vpop.f32.mrb[13].mxu0 }
 0x40c   :  { %v495_v35 = vpop.f32.mrb[14].mxu0 }
 0x40d   :  { %v500_v36 = vadd.f32 %v1332_v20, %v499_v31  ;;  %v959_v37 = vpop.f32.mrb[15].mxu0  ;;  %v507_v41 = vadd.f32 %v1338_v29, %v499_v31 }
 0x40f   :  { %v788_v38 = vmul.f32 -1.442695, %v500_v36 }
 0x411   :  { %1079 = vpow2.f32 %v788_v38 }
 0x41b   :  { %v1080_v39 = vpop.eup %1079 }
 0x41c   :  { %v504_v40 = vadd.f32 1.0, %v1080_v39 }
 0x41e   :  { %1081 = vrcp.f32 %v504_v40 }
 0x41f   :  { %1083 = vtanh.f32 %v507_v41 }
 0x428   :  { %v1082_v46 = vpop.eup %1081 }
 0x429   :  { %v509_v47 = vmul.f32 %v1082_v46, %v1341_v32  ;;  %v1084_v49 = vpop.eup %1083  ;;  %v512_v50 = vmul.f32 %v1082_v46, %v456_v27 }
 0x42b   :  { %v510_v48 = vsub.f32 %v1343_v34, %v509_v47 }
 0x42d   :  { %v511_v18 = vmul.f32 %v1084_v49, %v510_v48 }
 0x42f   :  { %v513_v51 = vadd.f32 %v512_v50, %v511_v18 }
 0x431   :  { %v514_v52 = vpack.c.bf16 %v513_v51, %v513_v51 }
 0x433   :  { %977 = vmatmul.mubr.bf16.vlgmr.msra.gmra.mrb[8].mxu1 %v514_v52 }
 0x434   :  { %1001 = vmatpush3.bf16.msra.mxu1 %v1234_v0  ;;  %1016 = vmatprep.mubr.msk.bf16.mxu1 %vm1176_vm1, %v1175_v1 }
 0x435   :  { %1002 = vmatprep.subr.bf16.mxu1 %v1175_v1 }
 0x438   :  { %1003 = vmatpush3.bf16.msra.mxu1 %v1238_v2 }
 0x439   :  { %1004 = vmatprep.subr.bf16.mxu1 %v1175_v1 }
 0x43c   :  { %1005 = vmatpush3.bf16.msra.mxu1 %v1243_v3 }
 0x43d   :  { %1006 = vmatprep.subr.bf16.mxu1 %v1175_v1 }
 0x440   :  { %1007 = vmatpush3.bf16.msra.mxu1 %v1258_v8 }
 0x441   :  { %1008 = vmatprep.subr.bf16.mxu1 %v1175_v1 }
 0x444   :  { %1009 = vmatpush3.bf16.msra.mxu1 %v1266_v9 }
 0x445   :  { %1010 = vmatprep.subr.bf16.mxu1 %v1175_v1 }
 0x448   :  { %1011 = vmatpush3.bf16.msra.mxu1 %v1272_v10 }
 0x449   :  { %1012 = vmatprep.subr.bf16.mxu1 %v1175_v1 }
 0x44c   :  { %1013 = vmatpush3.bf16.msra.mxu1 %v1278_v11 }
 0x44d   :  { %1014 = vmatprep.subr.bf16.mxu1 %v1175_v1 }
 0x450   :  { %1015 = vmatpush3.bf16.msra.mxu1 %v1284_v12 }
 0x506   :  { %v549_v53 = vpop.f32.mrb[8].mxu1 }
 0x507   :  { %v556_v54 = vadd.f32 %v549_v53, %v1367_v43  ;;  %v978_v55 = vpop.f32.mrb[9].mxu1 }
 0x508   :  { %v552_v56 = vpop.f32.mrb[10].mxu1 }
 0x509   :  { %v557_v57 = vadd.f32 %v1332_v20, %v556_v54  ;;  %v979_v58 = vpop.f32.mrb[11].mxu1  ;;  %v564_v62 = vadd.f32 %v1338_v29, %v556_v54 }
 0x50b   :  { %v789_v59 = vmul.f32 -1.442695, %v557_v57 }
 0x50d   :  { %1085 = vpow2.f32 %v789_v59 }
 0x517   :  { %v1086_v60 = vpop.eup %1085 }
 0x518   :  { %v561_v61 = vadd.f32 1.0, %v1086_v60 }
 0x51a   :  { %1087 = vrcp.f32 %v561_v61 }
 0x51b   :  { %1089 = vtanh.f32 %v564_v62 }
 0x524   :  { %v1088_v63 = vpop.eup %1087 }
 0x525   :  { %v566_v4 = vmul.f32 %v1088_v63, %v1341_v32  ;;  %v1090_v6 = vpop.eup %1089  ;;  %v569_v7 = vmul.f32 %v1088_v63, %v513_v51 }
 0x527   :  { %v567_v5 = vsub.f32 %v1343_v34, %v566_v4 }
 0x529   :  { %v568_v43 = vmul.f32 %v1090_v6, %v567_v5 }
 0x52b   :  { %v570_v13 = vadd.f32 %v569_v7, %v568_v43 }
 0x52d   :  { %v571_v14 = vpack.c.bf16 %v570_v13, %v570_v13 }
 0x52f   :  { %997 = vmatmul.mubr.bf16.vlgmr.msra.gmra.mrb[16].mxu0 %v571_v14 }
 0x530   :  { %1021 = vmatpush3.bf16.msra.mxu0 %v1234_v0  ;;  %1036 = vmatprep.mubr.msk.bf16.mxu0 %vm1176_vm1, %v1175_v1 }
 0x531   :  { %1022 = vmatprep.subr.bf16.mxu0 %v1175_v1 }
 0x534   :  { %1023 = vmatpush3.bf16.msra.mxu0 %v1238_v2 }
 0x535   :  { %1024 = vmatprep.subr.bf16.mxu0 %v1175_v1 }
 0x538   :  { %1025 = vmatpush3.bf16.msra.mxu0 %v1243_v3 }
 0x539   :  { %1026 = vmatprep.subr.bf16.mxu0 %v1175_v1 }
 0x53c   :  { %1027 = vmatpush3.bf16.msra.mxu0 %v1258_v8 }
 0x53d   :  { %1028 = vmatprep.subr.bf16.mxu0 %v1175_v1 }
 0x540   :  { %1029 = vmatpush3.bf16.msra.mxu0 %v1266_v9 }
 0x541   :  { %1030 = vmatprep.subr.bf16.mxu0 %v1175_v1 }
 0x544   :  { %1031 = vmatpush3.bf16.msra.mxu0 %v1272_v10 }
 0x545   :  { %1032 = vmatprep.subr.bf16.mxu0 %v1175_v1 }
 0x548   :  { %1033 = vmatpush3.bf16.msra.mxu0 %v1278_v11 }
 0x549   :  { %1034 = vmatprep.subr.bf16.mxu0 %v1175_v1 }
 0x54c   :  { %1035 = vmatpush3.bf16.msra.mxu0 %v1284_v12 }
 0x602   :  { %v606_v0 = vpop.f32.mrb[16].mxu0 }
 0x603   :  { %v613_v2 = vadd.f32 %v606_v0, %v1371_v45  ;;  %v998_v3 = vpop.f32.mrb[17].mxu0 }
 0x604   :  { %v609_v8 = vpop.f32.mrb[18].mxu0 }
 0x605   :  { %v614_v15 = vadd.f32 %v1332_v20, %v613_v2  ;;  %v999_v9 = vpop.f32.mrb[19].mxu0  ;;  %v621_v21 = vadd.f32 %v1338_v29, %v613_v2 }
 0x607   :  { %v790_v17 = vmul.f32 -1.442695, %v614_v15 }
 0x609   :  { %1091 = vpow2.f32 %v790_v17 }
 0x613   :  { %v1092_v19 = vpop.eup %1091 }
 0x614   :  { %v618_v10 = vadd.f32 1.0, %v1092_v19 }
 0x616   :  { %1093 = vrcp.f32 %v618_v10 }
 0x617   :  { %1095 = vtanh.f32 %v621_v21 }
 0x620   :  { %v1094_v11 = vpop.eup %1093 }
 0x621   :  { %v623_v1 = vmul.f32 %v1094_v11, %v1341_v32  ;;  %v1096_v22 = vpop.eup %1095  ;;  %v626_v23 = vmul.f32 %v1094_v11, %v570_v13 }
 0x623   :  { %v624_v12 = vsub.f32 %v1343_v34, %v623_v1 }
 0x625   :  { %v625_v45 = vmul.f32 %v1096_v22, %v624_v12 }
 0x627   :  { %v627_v24 = vadd.f32 %v626_v23, %v625_v45 }
 0x629   :  { %v628_v25 = vpack.c.bf16 %v627_v24, %v627_v24 }
 0x62b   :  { %1017 = vmatmul.mubr.bf16.vlgmr.msra.gmra.mrb[12].mxu1 %v628_v25 }
 0x6fe   :  { %v663_v16 = vpop.f32.mrb[12].mxu1 }
 0x6ff   :  { %v670_v26 = vadd.f32 %v1365_v42, %v663_v16  ;;  %v1018_v27 = vpop.f32.mrb[13].mxu1 }
 0x700   :  { %v666_v28 = vpop.f32.mrb[14].mxu1 }
 0x701   :  { %v671_v30 = vadd.f32 %v1332_v20, %v670_v26  ;;  %v1019_v31 = vpop.f32.mrb[15].mxu1  ;;  %v678_v37 = vadd.f32 %v1338_v29, %v670_v26 }
 0x703   :  { %v791_v33 = vmul.f32 -1.442695, %v671_v30 }
 0x705   :  { %1097 = vpow2.f32 %v791_v33 }
 0x70f   :  { %v1098_v35 = vpop.eup %1097 }
 0x710   :  { %v675_v36 = vadd.f32 1.0, %v1098_v35 }
 0x712   :  { %1099 = vrcp.f32 %v675_v36 }
 0x713   :  { %1101 = vtanh.f32 %v678_v37 }
 0x71c   :  { %v1100_v38 = vpop.eup %1099 }
 0x71d   :  { %v680_v39 = vmul.f32 %v1100_v38, %v1341_v32  ;;  %v1102_v41 = vpop.eup %1101  ;;  %v683_v46 = vmul.f32 %v1100_v38, %v627_v24 }
 0x71f   :  { %v681_v40 = vsub.f32 %v1343_v34, %v680_v39 }
 0x721   :  { %v682_v42 = vmul.f32 %v1102_v41, %v681_v40 }
 0x723   :  { %v684_v47 = vadd.f32 %v683_v46, %v682_v42 }
 0x725   :  { %v685_v48 = vpack.c.bf16 %v684_v47, %v684_v47 }
 0x727   :  { %1037 = vmatmul.mubr.bf16.vlgmr.msra.gmra.mrb[20].mxu0 %v685_v48 }
 0x7fa   :  { %v720_v49 = vpop.f32.mrb[20].mxu0 }
 0x7fb   :  { %v727_v18 = vadd.f32 %v1369_v44, %v720_v49  ;;  %v1038_v50 = vpop.f32.mrb[21].mxu0 }
 0x7fc   :  { %v723_v51 = vpop.f32.mrb[22].mxu0 }
 0x7fd   :  { %v728_v52 = vadd.f32 %v1332_v20, %v727_v18  ;;  %v1039_v53 = vpop.f32.mrb[23].mxu0  ;;  %v735_v57 = vadd.f32 %v1338_v29, %v727_v18 }
 0x7ff   :  { %v792_v54 = vmul.f32 -1.442695, %v728_v52 }
 0x801   :  { %1103 = vpow2.f32 %v792_v54 }
 0x80b   :  { %v1104_v55 = vpop.eup %1103 }
 0x80c   :  { %v732_v56 = vadd.f32 1.0, %v1104_v55 }
 0x80e   :  { %1105 = vrcp.f32 %v732_v56 }
 0x80f   :  { %1107 = vtanh.f32 %v735_v57 }
 0x818   :  { %v1106_v58 = vpop.eup %1105 }
 0x819   :  { %v737_v59 = vmul.f32 %v1106_v58, %v1341_v32  ;;  %v1108_v61 = vpop.eup %1107  ;;  %v740_v62 = vmul.f32 %v1106_v58, %v684_v47 }
 0x81b   :  { %v738_v60 = vsub.f32 %v1343_v34, %v737_v59 }
 0x81d   :  { %v739_v44 = vmul.f32 %v1108_v61, %v738_v60 }
 0x81f   :  { %v741_v20 = vadd.f32 %v740_v62, %v739_v44 }
 0x821   :  { %743 = vst [vmem:[#allocation10] sm:$0xff] %v741_v20 }
 0x822   :  { %1154 = shalt.err (!%p1151_p3)
}
 0x823   :  { %s1155_s11 = scalar_lea.hbm %s1496_s7, 128 }
 0x824   :  { %p1156_p4 = scmp.ne.s32.totalorder %s1496_s7, %s1155_s11  ;;  %p1159_p5 = scmp.lt.u32.totalorder %s1155_s11, %s1496_s7 }
 0x826   :  { %p1161_p6 = pnand %p1159_p5, %p1156_p4 }
 0x828   :  { %1164 = shalt.err (!%p1161_p6)
}
 0x829   :  { %753 = dma.vmem_to_hbm [thread:$0]  %s751_s30, 128, %s1496_s7, [#allocation7]  }
 0x82a   :  { %1169 = dma.done.wait [#allocation7], 128  }
 0x82b   :  { %1170 = vsyncadd [#allocation7], 4294967168 }
 0x82c   :  { %757 = vsyncpa [#allocation6], 1 }
 0x82d   :  { %758 = vsyncpa [#allocation7], 1 }
 0x82e   :  { %759 = vsyncpa [#allocation8], 1 }

</bundles_post_ra>
